<compile_context>
chip_gen: v7x
topology: tpu7x:2x2x1
jax: 0.10.0
libtpu: 0.0.40
codegen_flags: <defaults>
</compile_context>

<pallas_src>
import jax
import jax.numpy as jnp
from jax.experimental import pallas as pl
from jax.experimental.pallas import tpu as pltpu

TEXT_DIM = 768
IMAGE_DIM = 512
HIDDEN_DIM = 512
NUM_CLASSES = 2
OUT_PAD = 128          # lane-dense output width; logits live in [:, :NUM_CLASSES]


def _fusion_classifier_kernel(text_ref, image_ref,
                              w1t_ref, w1i_ref, b1_ref,
                              w2_ref, b2_ref,
                              out_ref):
    """Fused classifier head, one batch tile per grid step.

    text_ref : (TB, TEXT_DIM)           bf16  VMEM
    image_ref: (TB, IMAGE_DIM)          bf16  VMEM
    w1t_ref  : (TEXT_DIM, HIDDEN_DIM)   bf16  -- rows [:768]  of Linear1 W.T
    w1i_ref  : (IMAGE_DIM, HIDDEN_DIM)  bf16  -- rows [768:]  of Linear1 W.T
    b1_ref   : (1, HIDDEN_DIM)          f32
    w2_ref   : (HIDDEN_DIM, OUT_PAD)    f32   (zero-padded beyond NUM_CLASSES)
    b2_ref   : (1, OUT_PAD)             f32   (zero-padded beyond NUM_CLASSES)
    out_ref  : (TB, OUT_PAD)            f32
    """
    # Linear(text_dim + image_dim, hidden_dim) on the concatenation, written as
    # two MXU matmuls (exactly equivalent to concat along dim=1).
    h = jnp.dot(text_ref[...], w1t_ref[...], preferred_element_type=jnp.float32)
    h += jnp.dot(image_ref[...], w1i_ref[...], preferred_element_type=jnp.float32)
    h += b1_ref[...]                       # broadcast (1, H) over batch
    h = jnp.maximum(h, 0.0)                # ReLU
    # Dropout(0.3): identity at inference time.
    logits = jnp.dot(h, w2_ref[...], preferred_element_type=jnp.float32)
    logits += b2_ref[...]
    out_ref[...] = logits.astype(out_ref.dtype)


def fusion_classifier(text_feat, image_feat, params, *, tb=256):
    """Runs the fusion classifier head as a batch-tiled Pallas kernel."""
    B = text_feat.shape[0]

    # ---- batch tiling: sublane-aligned (multiple of 8), padded batch --------
    b_pad8 = max(8, -(-B // 8) * 8)
    TB = min(tb, b_pad8)
    B_pad = -(-b_pad8 // TB) * TB
    if B_pad != B:
        pad = B_pad - B
        text_feat = jnp.pad(text_feat, ((0, pad), (0, 0)))
        image_feat = jnp.pad(image_feat, ((0, pad), (0, 0)))

    # ---- weights: bf16 W1 (halves dominant weight DMA), lane-padded W2/b2 ---
    w1, b1, w2, b2 = params["w1"], params["b1"], params["w2"], params["b2"]
    w1t = w1[:TEXT_DIM, :].astype(jnp.bfloat16)
    w1i = w1[TEXT_DIM:, :].astype(jnp.bfloat16)
    b1r = b1.reshape(1, HIDDEN_DIM).astype(jnp.float32)
    w2p = jnp.zeros((HIDDEN_DIM, OUT_PAD), jnp.float32).at[:, :NUM_CLASSES].set(w2)
    b2p = jnp.zeros((1, OUT_PAD), jnp.float32).at[:, :NUM_CLASSES].set(
        b2.reshape(1, NUM_CLASSES))

    text_bf = text_feat.astype(jnp.bfloat16)
    image_bf = image_feat.astype(jnp.bfloat16)

    grid = (B_pad // TB,)

    flops = (2 * B_pad * (TEXT_DIM + IMAGE_DIM) * HIDDEN_DIM
             + 2 * B_pad * HIDDEN_DIM * OUT_PAD)
    bytes_accessed = ((w1t.size + w1i.size) * 2
                      + (w2p.size + b2p.size + b1r.size) * 4
                      + (text_bf.size + image_bf.size) * 2
                      + B_pad * OUT_PAD * 4)

    out = pl.pallas_call(
        _fusion_classifier_kernel,
        out_shape=jax.ShapeDtypeStruct((B_pad, OUT_PAD), jnp.float32),
        grid_spec=pltpu.PrefetchScalarGridSpec(
            num_scalar_prefetch=0,
            grid=grid,
            in_specs=[
                # activations: one batch tile per grid step (pipelined DMA)
                pl.BlockSpec((TB, TEXT_DIM), lambda i: (i, 0)),
                pl.BlockSpec((TB, IMAGE_DIM), lambda i: (i, 0)),
                # weights/biases: same block every step -> VMEM-resident
                pl.BlockSpec((TEXT_DIM, HIDDEN_DIM), lambda i: (0, 0)),
                pl.BlockSpec((IMAGE_DIM, HIDDEN_DIM), lambda i: (0, 0)),
                pl.BlockSpec((1, HIDDEN_DIM), lambda i: (0, 0)),
                pl.BlockSpec((HIDDEN_DIM, OUT_PAD), lambda i: (0, 0)),
                pl.BlockSpec((1, OUT_PAD), lambda i: (0, 0)),
            ],
            out_specs=pl.BlockSpec((TB, OUT_PAD), lambda i: (i, 0)),
        ),
        compiler_params=pltpu.CompilerParams(
            dimension_semantics=("parallel",),   # v7x: batch split over 2 TCs
            vmem_limit_bytes=16 << 20,           # resident weights + 2x-buffered tiles
        ),
        cost_estimate=pl.CostEstimate(
            flops=flops, transcendentals=0, bytes_accessed=bytes_accessed),
    )(text_bf, image_bf, w1t, w1i, b1r, w2p, b2p)

    # Drop batch padding and lane padding outside the kernel.
    return out[:B, :NUM_CLASSES]


def init_params(key):
    """Deterministic synthetic parameters matching nn.Linear shapes.

    Stored transposed relative to PyTorch (as (in_features, out_features))
    so the kernel does plain row-major matmuls.
    """
    k1, k2, k3, k4 = jax.random.split(key, 4)
    in1 = TEXT_DIM + IMAGE_DIM
    s1 = 1.0 / jnp.sqrt(in1)
    s2 = 1.0 / jnp.sqrt(HIDDEN_DIM)
    return {
        "w1": jax.random.uniform(k1, (in1, HIDDEN_DIM), jnp.float32, -s1, s1),
        "b1": jax.random.uniform(k2, (HIDDEN_DIM,), jnp.float32, -s1, s1),
        "w2": jax.random.uniform(k3, (HIDDEN_DIM, NUM_CLASSES), jnp.float32, -s2, s2),
        "b2": jax.random.uniform(k4, (NUM_CLASSES,), jnp.float32, -s2, s2),
    }


def reference_forward(text_feat, image_feat, params):
    fused = jnp.concatenate([text_feat, image_feat], axis=1)
    h = jnp.maximum(fused @ params["w1"] + params["b1"], 0.0)
    return h @ params["w2"] + params["b2"]


if __name__ == "__main__":
    key = jax.random.PRNGKey(0)
    kp, kt, ki = jax.random.split(key, 3)

    B = 4  # small batch (gets padded to a sublane-aligned tile internally)
    params = init_params(kp)
    # Stand-ins for the frozen encoder outputs.
    text_feat = jax.random.normal(kt, (B, TEXT_DIM), dtype=jnp.float32)
    image_feat = jax.random.normal(ki, (B, IMAGE_DIM), dtype=jnp.float32)

    out = fusion_classifier(text_feat, image_feat, params)
    out = jax.block_until_ready(out)

    ref = reference_forward(text_feat, image_feat, params)
    assert out.shape == (B, NUM_CLASSES)
    # bf16 weights/activations with f32 accumulation -> looser tolerance vs f32 ref.
    assert jnp.allclose(out, ref, atol=2e-2, rtol=2e-2), "mismatch vs reference"

    print("KERNEL_OK")
</pallas_src>

<mosaic_0001>
module attributes {stable_mosaic.version = 11 : i64} {
  func.func @_fusion_classifier_kernel(%arg0: i32, %arg1: memref<8x768xbf16, #tpu.memory_space<vmem>>, %arg2: memref<8x512xbf16, #tpu.memory_space<vmem>>, %arg3: memref<768x512xbf16, #tpu.memory_space<vmem>>, %arg4: memref<512x512xbf16, #tpu.memory_space<vmem>>, %arg5: memref<1x512xf32, #tpu.memory_space<vmem>>, %arg6: memref<512x128xf32, #tpu.memory_space<vmem>>, %arg7: memref<1x128xf32, #tpu.memory_space<vmem>>, %arg8: memref<8x128xf32, #tpu.memory_space<vmem>>) attributes {dimension_semantics = [#tpu.dimension_semantics<parallel>], iteration_bounds = array<i64: 1>, scalar_prefetch = 0 : i64, scratch_operands = 0 : i64, tpu.core_type = #tpu.core_type<tc>, window_params = [{transform_indices = @transform_0, window_bounds = array<i64: 8, 768>}, {transform_indices = @transform_1, window_bounds = array<i64: 8, 512>}, {pipeline_mode = #tpu.pipeline_mode<synchronous>, transform_indices = @transform_2, window_bounds = array<i64: 768, 512>}, {pipeline_mode = #tpu.pipeline_mode<synchronous>, transform_indices = @transform_3, window_bounds = array<i64: 512, 512>}, {pipeline_mode = #tpu.pipeline_mode<synchronous>, transform_indices = @transform_4, window_bounds = array<i64: 1, 512>}, {pipeline_mode = #tpu.pipeline_mode<synchronous>, transform_indices = @transform_5, window_bounds = array<i64: 512, 128>}, {pipeline_mode = #tpu.pipeline_mode<synchronous>, transform_indices = @transform_6, window_bounds = array<i64: 1, 128>}, {transform_indices = @transform_7, window_bounds = array<i64: 8, 128>}]} {
    %c0 = arith.constant 0 : index
    %c0_0 = arith.constant 0 : index
    %0 = vector.load %arg1[%c0, %c0_0] : memref<8x768xbf16, #tpu.memory_space<vmem>>, vector<8x768xbf16>
    %c0_1 = arith.constant 0 : index
    %c0_2 = arith.constant 0 : index
    %1 = vector.load %arg3[%c0_1, %c0_2] : memref<768x512xbf16, #tpu.memory_space<vmem>>, vector<768x512xbf16>
    %cst = arith.constant dense<0.000000e+00> : vector<8x512xf32>
    %2 = tpu.matmul %0, %1, %cst {dimension_numbers = #tpu.dot_dimension_numbers<[1], [0], [0], [1], [0, 0, 1, 1], [], []>} : vector<8x768xbf16>, vector<768x512xbf16>, vector<8x512xf32> -> vector<8x512xf32>
    %c0_3 = arith.constant 0 : index
    %c0_4 = arith.constant 0 : index
    %3 = vector.load %arg2[%c0_3, %c0_4] : memref<8x512xbf16, #tpu.memory_space<vmem>>, vector<8x512xbf16>
    %c0_5 = arith.constant 0 : index
    %c0_6 = arith.constant 0 : index
    %4 = vector.load %arg4[%c0_5, %c0_6] : memref<512x512xbf16, #tpu.memory_space<vmem>>, vector<512x512xbf16>
    %cst_7 = arith.constant dense<0.000000e+00> : vector<8x512xf32>
    %5 = tpu.matmul %3, %4, %cst_7 {dimension_numbers = #tpu.dot_dimension_numbers<[1], [0], [0], [1], [0, 0, 1, 1], [], []>} : vector<8x512xbf16>, vector<512x512xbf16>, vector<8x512xf32> -> vector<8x512xf32>
    %6 = arith.addf %2, %5 : vector<8x512xf32>
    %c0_8 = arith.constant 0 : index
    %c0_9 = arith.constant 0 : index
    %7 = vector.load %arg5[%c0_8, %c0_9] : memref<1x512xf32, #tpu.memory_space<vmem>>, vector<1x512xf32>
    %8 = vector.broadcast %7 : vector<1x512xf32> to vector<8x512xf32>
    %9 = arith.addf %6, %8 : vector<8x512xf32>
    %cst_10 = arith.constant 0.000000e+00 : f32
    %10 = vector.broadcast %cst_10 : f32 to vector<8x512xf32>
    %11 = arith.maximumf %9, %10 : vector<8x512xf32>
    %c0_11 = arith.constant 0 : index
    %c0_12 = arith.constant 0 : index
    %12 = vector.load %arg6[%c0_11, %c0_12] : memref<512x128xf32, #tpu.memory_space<vmem>>, vector<512x128xf32>
    %cst_13 = arith.constant dense<0.000000e+00> : vector<8x128xf32>
    %13 = tpu.matmul %11, %12, %cst_13 {dimension_numbers = #tpu.dot_dimension_numbers<[1], [0], [0], [1], [0, 0, 1, 1], [], []>} : vector<8x512xf32>, vector<512x128xf32>, vector<8x128xf32> -> vector<8x128xf32>
    %c0_14 = arith.constant 0 : index
    %c0_15 = arith.constant 0 : index
    %14 = vector.load %arg7[%c0_14, %c0_15] : memref<1x128xf32, #tpu.memory_space<vmem>>, vector<1x128xf32>
    %15 = vector.broadcast %14 : vector<1x128xf32> to vector<8x128xf32>
    %16 = arith.addf %13, %15 : vector<8x128xf32>
    %c0_16 = arith.constant 0 : index
    %c0_17 = arith.constant 0 : index
    %17 = vector.load %arg8[%c0_16, %c0_17] : memref<8x128xf32, #tpu.memory_space<vmem>>, vector<8x128xf32>
    tpu.vector_store %arg8[%c0_16, %c0_17], %16 {strides = array<i32>} : memref<8x128xf32, #tpu.memory_space<vmem>>, vector<8x128xf32>,
    return
  }
  func.func @transform_0(%arg0: i32) -> (i32, i32) {
    %c0_i32 = arith.constant 0 : i32
    %c0_i32_0 = arith.constant 0 : i32
    return %arg0, %c0_i32 : i32, i32
  }
  func.func @transform_1(%arg0: i32) -> (i32, i32) {
    %c0_i32 = arith.constant 0 : i32
    %c0_i32_0 = arith.constant 0 : i32
    return %arg0, %c0_i32 : i32, i32
  }
  func.func @transform_2(%arg0: i32) -> (i32, i32) {
    %c0_i32 = arith.constant 0 : i32
    %c0_i32_0 = arith.constant 0 : i32
    %c0_i32_1 = arith.constant 0 : i32
    return %c0_i32, %c0_i32_0 : i32, i32
  }
  func.func @transform_3(%arg0: i32) -> (i32, i32) {
    %c0_i32 = arith.constant 0 : i32
    %c0_i32_0 = arith.constant 0 : i32
    %c0_i32_1 = arith.constant 0 : i32
    return %c0_i32, %c0_i32_0 : i32, i32
  }
  func.func @transform_4(%arg0: i32) -> (i32, i32) {
    %c0_i32 = arith.constant 0 : i32
    %c0_i32_0 = arith.constant 0 : i32
    %c0_i32_1 = arith.constant 0 : i32
    return %c0_i32, %c0_i32_0 : i32, i32
  }
  func.func @transform_5(%arg0: i32) -> (i32, i32) {
    %c0_i32 = arith.constant 0 : i32
    %c0_i32_0 = arith.constant 0 : i32
    %c0_i32_1 = arith.constant 0 : i32
    return %c0_i32, %c0_i32_0 : i32, i32
  }
  func.func @transform_6(%arg0: i32) -> (i32, i32) {
    %c0_i32 = arith.constant 0 : i32
    %c0_i32_0 = arith.constant 0 : i32
    %c0_i32_1 = arith.constant 0 : i32
    return %c0_i32, %c0_i32_0 : i32, i32
  }
  func.func @transform_7(%arg0: i32) -> (i32, i32) {
    %c0_i32 = arith.constant 0 : i32
    %c0_i32_0 = arith.constant 0 : i32
    return %arg0, %c0_i32 : i32, i32
  }
}

</mosaic_0001>

<bundles_post_ra>
// kernel: tpu_custom_call.1
= control target key start
LH: loop header
LB: loop body
LE: loop exit
PB: predicated region body
PF: predicated region fallthrough
CT: control target
= control target key end

     0   :  { %12 = vsyncpa [#allocation3], 0  ;;  %s4025_s0 = inlined_call_operand.hbm [shape: bf16[8,768], index: 0, kind: input, shape index: {}]   ;;  %s4026_s1 = inlined_call_operand.hbm [shape: bf16[8,512], index: 1, kind: input, shape index: {}]   ;;  %s4027_s2 = inlined_call_operand.hbm [shape: bf16[768,512], index: 2, kind: input, shape index: {}]   ;;  %s4028_s3 = inlined_call_operand.hbm [shape: bf16[512,512], index: 3, kind: input, shape index: {}]   ;;  %s4029_s4 = inlined_call_operand.vmem [shape: f32[1,512], index: 4, kind: input, shape index: {}]   ;;  %s4030_s5 = inlined_call_operand.hbm [shape: f32[512,128], index: 5, kind: input, shape index: {}]   ;;  %s4031_s6 = inlined_call_operand.vmem [shape: f32[1,128], index: 6, kind: input, shape index: {}]   ;;  %s4032_s7 = inlined_call_operand.hbm [shape: f32[8,128], index: 7, kind: output, shape index: {}]  }
   0x1   :  { %13 = vsyncpa [#allocation6], 0 }
   0x2   :  { %14 = vsyncpa [#allocation9], 0 }
   0x3   :  { %15 = vsyncpa [#allocation4], 0  ;;  %s3825_s24 = smov [#allocation5]   ;;  %s3685_s28 = scalar_lea.hbm %s4026_s1, 256 }
   0x4   :  { %s32_s25 = sshll.u32 %s3825_s24, 4  ;;  %p3686_p0 = scmp.ne.s32.totalorder %s4026_s1, %s3685_s28  ;;  %s33_s25 = int_to_ptr.vmem [resolvable:$true] %s32_s25 }
   0x5   :  { %p3689_p1 = scmp.lt.u32.totalorder %s3685_s28, %s4026_s1 }
   0x7   :  { %p3691_p2 = pnand %p3689_p1, %p3686_p0 }
   0x9   :  { %3694 = shalt.err (!%p3691_p2)
}
   0xa   :  { %s3695_s10 = scalar_lea.vmem %s33_s25, 256  ;;  %p3700_p4 = scmp.lt.s32.totalorder %s33_s25, %s33_s25 }
   0xb   :  { %p3696_p3 = scmp.ne.s32.totalorder %s33_s25, %s3695_s10  ;;  %p3701_p5 = scmp.lt.s32.totalorder %s3695_s10, %s3695_s10 }
   0xd   :  { %p3702_p6 = por %p3701_p5, %p3700_p4 }
   0xf   :  { %p3703_p7 = pnand %p3702_p6, %p3696_p3 }
  0x11   :  { %3706 = shalt.err (!%p3703_p7)
}
  0x12   :  { %35 = dma.hbm_to_vmem [thread:$0]  %s4026_s1, 256, %s33_s25, [#allocation6]  }
  0x13   :  { %s3826_s13 = smov [#allocation8]   ;;  %s3827_s15 = smov [#allocation2]  }
  0x14   :  { %s53_s14 = sshll.u32 %s3826_s13, 4  ;;  %s22_s16 = sshll.u32 %s3827_s15, 4  ;;  %s54_s14 = int_to_ptr.vmem [resolvable:$true] %s53_s14  ;;  %s23_s16 = int_to_ptr.vmem [resolvable:$true] %s22_s16 }
  0x15   :  { %s3707_s19 = scalar_lea.hbm %s4028_s3, 16384 }
  0x16   :  { %p3708_p8 = scmp.ne.s32.totalorder %s4028_s3, %s3707_s19  ;;  %p3711_p9 = scmp.lt.u32.totalorder %s3707_s19, %s4028_s3 }
  0x18   :  { %p3713_p10 = pnand %p3711_p9, %p3708_p8 }
  0x1a   :  { %3716 = shalt.err (!%p3713_p10)
}
  0x1b   :  { %s3717_s1 = scalar_lea.vmem %s54_s14, 16384  ;;  %p3722_p12 = scmp.lt.s32.totalorder %s54_s14, %s54_s14 }
  0x1c   :  { %p3718_p11 = scmp.ne.s32.totalorder %s54_s14, %s3717_s1  ;;  %p3723_p13 = scmp.lt.s32.totalorder %s3717_s1, %s3717_s1 }
  0x1e   :  { %p3724_p0 = por %p3723_p13, %p3722_p12 }
  0x20   :  { %p3725_p1 = pnand %p3724_p0, %p3718_p11 }
  0x22   :  { %3728 = shalt.err (!%p3725_p1)
}
  0x23   :  { %s3828_s24 = smov 256   ;;  %s3829_s25 = smov 16  }
  0x24   :  { %59 = dma.hbm_to_vmem [thread:$0]  %s4028_s3, 16384, %s54_s14, [#allocation9], %s3828_s24, %s3828_s24, %s3829_s25  }
  0x25   :  { %s3729_s30 = scalar_lea.hbm %s4025_s0, 384 }
  0x26   :  { %p3730_p2 = scmp.ne.s32.totalorder %s4025_s0, %s3729_s30  ;;  %p3733_p3 = scmp.lt.u32.totalorder %s3729_s30, %s4025_s0 }
  0x28   :  { %p3735_p4 = pnand %p3733_p3, %p3730_p2 }
  0x2a   :  { %3738 = shalt.err (!%p3735_p4)
}
  0x2b   :  { %s3739_s12 = scalar_lea.vmem %s23_s16, 384  ;;  %p3744_p6 = scmp.lt.s32.totalorder %s23_s16, %s23_s16 }
  0x2c   :  { %p3740_p5 = scmp.ne.s32.totalorder %s23_s16, %s3739_s12  ;;  %p3745_p7 = scmp.lt.s32.totalorder %s3739_s12, %s3739_s12 }
  0x2e   :  { %p3746_p8 = por %p3745_p7, %p3744_p6 }
  0x30   :  { %p3747_p9 = pnand %p3746_p8, %p3740_p5 }
  0x32   :  { %3750 = shalt.err (!%p3747_p9)
}
  0x33   :  { %25 = dma.hbm_to_vmem [thread:$0]  %s4025_s0, 384, %s23_s16, [#allocation3]  }
  0x34   :  { %s3830_s14 = smov [#allocation7]   ;;  %s3831_s17 = smov [#allocation10]  }
  0x35   :  { %s41_s15 = sshll.u32 %s3830_s14, 4  ;;  %s67_s18 = sshll.u32 %s3831_s17, 4  ;;  %s42_s15 = int_to_ptr.vmem [resolvable:$true] %s41_s15  ;;  %s68_s18 = int_to_ptr.vmem [resolvable:$true] %s67_s18 }
  0x36   :  { %s3751_s21 = scalar_lea.hbm %s4027_s2, 24576 }
  0x37   :  { %p3752_p10 = scmp.ne.s32.totalorder %s4027_s2, %s3751_s21  ;;  %p3755_p11 = scmp.lt.u32.totalorder %s3751_s21, %s4027_s2 }
  0x39   :  { %p3757_p12 = pnand %p3755_p11, %p3752_p10 }
  0x3b   :  { %3760 = shalt.err (!%p3757_p12)
}
  0x3c   :  { %s3761_s0 = scalar_lea.vmem %s42_s15, 24576  ;;  %p3766_p0 = scmp.lt.s32.totalorder %s42_s15, %s42_s15 }
  0x3d   :  { %p3762_p13 = scmp.ne.s32.totalorder %s42_s15, %s3761_s0  ;;  %p3767_p1 = scmp.lt.s32.totalorder %s3761_s0, %s3761_s0 }
  0x3f   :  { %p3768_p2 = por %p3767_p1, %p3766_p0 }
  0x41   :  { %p3769_p3 = pnand %p3768_p2, %p3762_p13 }
  0x43   :  { %3772 = shalt.err (!%p3769_p3)
}
  0x44   :  { %47 = dma.hbm_to_vmem [thread:$0]  %s4027_s2, 24576, %s42_s15, [#allocation6], %s3828_s24, %s3828_s24, %s3829_s25  }
  0x45   :  { %s3773_s30 = scalar_lea.hbm %s4030_s5, 8192 }
  0x46   :  { %p3774_p4 = scmp.ne.s32.totalorder %s4030_s5, %s3773_s30  ;;  %p3777_p5 = scmp.lt.u32.totalorder %s3773_s30, %s4030_s5 }
  0x48   :  { %p3779_p6 = pnand %p3777_p5, %p3774_p4 }
  0x4a   :  { %3782 = shalt.err (!%p3779_p6)
}
  0x4b   :  { %s3783_s12 = scalar_lea.vmem %s68_s18, 8192  ;;  %p3788_p8 = scmp.lt.s32.totalorder %s68_s18, %s68_s18 }
  0x4c   :  { %p3784_p7 = scmp.ne.s32.totalorder %s68_s18, %s3783_s12  ;;  %p3789_p9 = scmp.lt.s32.totalorder %s3783_s12, %s3783_s12 }
  0x4e   :  { %p3790_p10 = por %p3789_p9, %p3788_p8 }
  0x50   :  { %p3791_p11 = pnand %p3790_p10, %p3784_p7 }
  0x52   :  { %3794 = shalt.err (!%p3791_p11)
}
  0x53   :  { %s3832_s2 = smov 128   ;;  %s3833_s24 = smov 8  }
  0x54   :  { %73 = dma.hbm_to_vmem [thread:$0]  %s4030_s5, 8192, %s68_s18, [#allocation9], %s3832_s2, %s3832_s2, %s3833_s24  }
  0x55   :  { %3817 = dma.done.wait [#allocation3], 384  }
  0x56   :  { %3818 = vsyncadd [#allocation3], 4294966912 }
  0x57   :  { %3819 = dma.done.wait [#allocation6], 24832  }
  0x58   :  { %3820 = vsyncadd [#allocation6], 4294942464 }
  0x59   :  { %3821 = dma.done.wait [#allocation9], 24576  }
  0x5a   :  { %3822 = vsyncadd [#allocation9], 4294942720  ;;  %v3195_v0 = vld [vmem:[#allocation8 + $0x4] ss:$16 sps:$4 sm:$0xff]   ;;  %v3199_v2 = vld [vmem:[#allocation8] ss:$16 sps:$4 sm:$0xff]  }
  0x5b   :  { %v3197_v1 = vld [vmem:[#allocation8 + $0x204] ss:$16 sps:$4 sm:$0xff]   ;;  %1070 = vmatprep.subr.bf16.mxu0 %v3195_v0  ;;  %v3200_v3 = vld [vmem:[#allocation8 + $0x200] ss:$16 sps:$4 sm:$0xff]   ;;  %v287_v48 = vld [vmem:[#allocation5 + $0x8] sm:$0xff]  ;;  %s3834_s15 = smov [#allocation11]  }
  0x5c   :  { %1111 = vmatprep.subr.bf16.mxu1 %v3197_v1  ;;  %v3201_v4 = vld [vmem:[#allocation8 + $0x24] ss:$16 sps:$4 sm:$0xff]   ;;  %1071 = vmatpush1.bf16.msra.mxu0 %v3199_v2  ;;  %v3205_v6 = vld [vmem:[#allocation8 + $0x20] ss:$16 sps:$4 sm:$0xff]   ;;  %v2723_v51 = vcombine.high %v287_v48, %v287_v48  ;;  %s2709_s17 = sshll.u32 %s3834_s15, 4  ;;  %s2710_s17 = int_to_ptr.vmem [resolvable:$true] %s2709_s17 }
  0x5d   :  { %1112 = vmatpush1.bf16.msra.mxu1 %v3200_v3  ;;  %v3203_v5 = vld [vmem:[#allocation8 + $0x224] ss:$16 sps:$4 sm:$0xff]   ;;  %1072 = vmatprep.subr.bf16.mxu0 %v3201_v4  ;;  %v3206_v7 = vld [vmem:[#allocation8 + $0x220] ss:$16 sps:$4 sm:$0xff]   ;;  %v3297_v4 = vld [vmem:[#allocation8 + $0xc] ss:$16 sps:$4 sm:$0xff]   ;;  %p3800_p13 = scmp.lt.s32.totalorder %s2710_s17, %s2710_s17 }
  0x5e   :  { %1113 = vmatprep.subr.bf16.mxu1 %v3203_v5  ;;  %v3207_v8 = vld [vmem:[#allocation8 + $0x44] ss:$16 sps:$4 sm:$0xff]   ;;  %v3211_v10 = vld [vmem:[#allocation8 + $0x40] ss:$16 sps:$4 sm:$0xff]   ;;  %1143 = vmatprep.mubr.bf16.mxu1 %v2723_v51  ;;  %v3300_v5 = vld [vmem:[#allocation8 + $0x20c] ss:$16 sps:$4 sm:$0xff]  }
  0x5f   :  { %v3209_v9 = vld [vmem:[#allocation8 + $0x244] ss:$16 sps:$4 sm:$0xff]   ;;  %v3212_v11 = vld [vmem:[#allocation8 + $0x240] ss:$16 sps:$4 sm:$0xff]   ;;  %s3795_s18 = scalar_lea.vmem %s2710_s17, 128 }
  0x60   :  { %1073 = vmatpush1.bf16.msra.mxu0 %v3205_v6  ;;  %v3213_v12 = vld [vmem:[#allocation8 + $0x64] ss:$16 sps:$4 sm:$0xff]   ;;  %v3217_v14 = vld [vmem:[#allocation8 + $0x60] ss:$16 sps:$4 sm:$0xff]   ;;  %p3796_p12 = scmp.ne.s32.totalorder %s2710_s17, %s3795_s18  ;;  %p3801_p0 = scmp.lt.s32.totalorder %s3795_s18, %s3795_s18 }
  0x61   :  { %1114 = vmatpush1.bf16.msra.mxu1 %v3206_v7  ;;  %1074 = vmatprep.subr.bf16.mxu0 %v3207_v8  ;;  %v3215_v13 = vld [vmem:[#allocation8 + $0x264] ss:$16 sps:$4 sm:$0xff]   ;;  %v3218_v15 = vld [vmem:[#allocation8 + $0x260] ss:$16 sps:$4 sm:$0xff]   ;;  %v3946_v7 = vcombine.low %v287_v48, %v287_v48  ;;  %v3295_v8 = vld [vmem:[#allocation8 + $0x8] ss:$16 sps:$4 sm:$0xff]  }
  0x62   :  { %1115 = vmatprep.subr.bf16.mxu1 %v3209_v9  ;;  %v3219_v16 = vld [vmem:[#allocation8 + $0x84] ss:$16 sps:$4 sm:$0xff]   ;;  %v3223_v18 = vld [vmem:[#allocation8 + $0x80] ss:$16 sps:$4 sm:$0xff]   ;;  %v3298_v9 = vld [vmem:[#allocation8 + $0x208] ss:$16 sps:$4 sm:$0xff]   ;;  %p3802_p1 = por %p3801_p0, %p3800_p13 }
  0x63   :  { %v3221_v17 = vld [vmem:[#allocation8 + $0x284] ss:$16 sps:$4 sm:$0xff]   ;;  %v3224_v19 = vld [vmem:[#allocation8 + $0x280] ss:$16 sps:$4 sm:$0xff]   ;;  %v3355_v48 = vld [vmem:[#allocation8 + $0x148] ss:$16 sps:$4 sm:$0xff]  }
  0x64   :  { %1075 = vmatpush1.bf16.msra.mxu0 %v3211_v10  ;;  %v3225_v20 = vld [vmem:[#allocation8 + $0xa4] ss:$16 sps:$4 sm:$0xff]   ;;  %v3229_v22 = vld [vmem:[#allocation8 + $0xa0] ss:$16 sps:$4 sm:$0xff]   ;;  %v3303_v10 = vld [vmem:[#allocation8 + $0x2c] ss:$16 sps:$4 sm:$0xff]   ;;  %p3803_p2 = pnand %p3802_p1, %p3796_p12 }
  0x65   :  { %1116 = vmatpush1.bf16.msra.mxu1 %v3212_v11  ;;  %1076 = vmatprep.subr.bf16.mxu0 %v3213_v12  ;;  %v3227_v21 = vld [vmem:[#allocation8 + $0x2a4] ss:$16 sps:$4 sm:$0xff]   ;;  %v3230_v23 = vld [vmem:[#allocation8 + $0x2a0] ss:$16 sps:$4 sm:$0xff]   ;;  %v3306_v11 = vld [vmem:[#allocation8 + $0x22c] ss:$16 sps:$4 sm:$0xff]  }
  0x66   :  { %1117 = vmatprep.subr.bf16.mxu1 %v3215_v13  ;;  %v3231_v24 = vld [vmem:[#allocation8 + $0xc4] ss:$16 sps:$4 sm:$0xff]   ;;  %v3235_v26 = vld [vmem:[#allocation8 + $0xc0] ss:$16 sps:$4 sm:$0xff]   ;;  %v3301_v12 = vld [vmem:[#allocation8 + $0x28] ss:$16 sps:$4 sm:$0xff]  }
  0x67   :  { %v3233_v25 = vld [vmem:[#allocation8 + $0x2c4] ss:$16 sps:$4 sm:$0xff]   ;;  %v3236_v27 = vld [vmem:[#allocation8 + $0x2c0] ss:$16 sps:$4 sm:$0xff]   ;;  %v3304_v13 = vld [vmem:[#allocation8 + $0x228] ss:$16 sps:$4 sm:$0xff]  }
  0x68   :  { %1077 = vmatpush1.bf16.msra.mxu0 %v3217_v14  ;;  %v3237_v28 = vld [vmem:[#allocation8 + $0xe4] ss:$16 sps:$4 sm:$0xff]   ;;  %v3241_v30 = vld [vmem:[#allocation8 + $0xe0] ss:$16 sps:$4 sm:$0xff]   ;;  %v3309_v14 = vld [vmem:[#allocation8 + $0x4c] ss:$16 sps:$4 sm:$0xff]  }
  0x69   :  { %1118 = vmatpush1.bf16.msra.mxu1 %v3218_v15  ;;  %1078 = vmatprep.subr.bf16.mxu0 %v3219_v16  ;;  %v3239_v29 = vld [vmem:[#allocation8 + $0x2e4] ss:$16 sps:$4 sm:$0xff]   ;;  %v3242_v31 = vld [vmem:[#allocation8 + $0x2e0] ss:$16 sps:$4 sm:$0xff]   ;;  %v3312_v15 = vld [vmem:[#allocation8 + $0x24c] ss:$16 sps:$4 sm:$0xff]  }
  0x6a   :  { %1119 = vmatprep.subr.bf16.mxu1 %v3221_v17  ;;  %v3243_v32 = vld [vmem:[#allocation8 + $0x104] ss:$16 sps:$4 sm:$0xff]   ;;  %v3247_v34 = vld [vmem:[#allocation8 + $0x100] ss:$16 sps:$4 sm:$0xff]   ;;  %v3307_v16 = vld [vmem:[#allocation8 + $0x48] ss:$16 sps:$4 sm:$0xff]  }
  0x6b   :  { %v3245_v33 = vld [vmem:[#allocation8 + $0x304] ss:$16 sps:$4 sm:$0xff]   ;;  %v3248_v35 = vld [vmem:[#allocation8 + $0x300] ss:$16 sps:$4 sm:$0xff]   ;;  %v3310_v17 = vld [vmem:[#allocation8 + $0x248] ss:$16 sps:$4 sm:$0xff]  }
  0x6c   :  { %1079 = vmatpush1.bf16.msra.mxu0 %v3223_v18  ;;  %v3249_v36 = vld [vmem:[#allocation8 + $0x124] ss:$16 sps:$4 sm:$0xff]   ;;  %v3253_v38 = vld [vmem:[#allocation8 + $0x120] ss:$16 sps:$4 sm:$0xff]   ;;  %v3315_v18 = vld [vmem:[#allocation8 + $0x6c] ss:$16 sps:$4 sm:$0xff]  }
  0x6d   :  { %1120 = vmatpush1.bf16.msra.mxu1 %v3224_v19  ;;  %1080 = vmatprep.subr.bf16.mxu0 %v3225_v20  ;;  %v3251_v37 = vld [vmem:[#allocation8 + $0x324] ss:$16 sps:$4 sm:$0xff]   ;;  %v3254_v39 = vld [vmem:[#allocation8 + $0x320] ss:$16 sps:$4 sm:$0xff]   ;;  %v3318_v19 = vld [vmem:[#allocation8 + $0x26c] ss:$16 sps:$4 sm:$0xff]  }
  0x6e   :  { %1121 = vmatprep.subr.bf16.mxu1 %v3227_v21  ;;  %v3255_v40 = vld [vmem:[#allocation8 + $0x144] ss:$16 sps:$4 sm:$0xff]   ;;  %v3259_v42 = vld [vmem:[#allocation8 + $0x140] ss:$16 sps:$4 sm:$0xff]   ;;  %v3313_v20 = vld [vmem:[#allocation8 + $0x68] ss:$16 sps:$4 sm:$0xff]  }
  0x6f   :  { %v3257_v41 = vld [vmem:[#allocation8 + $0x344] ss:$16 sps:$4 sm:$0xff]   ;;  %v3260_v43 = vld [vmem:[#allocation8 + $0x340] ss:$16 sps:$4 sm:$0xff]   ;;  %v3316_v21 = vld [vmem:[#allocation8 + $0x268] ss:$16 sps:$4 sm:$0xff]  }
  0x70   :  { %1081 = vmatpush1.bf16.msra.mxu0 %v3229_v22  ;;  %v3261_v44 = vld [vmem:[#allocation8 + $0x164] ss:$16 sps:$4 sm:$0xff]   ;;  %v3265_v49 = vld [vmem:[#allocation8 + $0x160] ss:$16 sps:$4 sm:$0xff]   ;;  %v3321_v22 = vld [vmem:[#allocation8 + $0x8c] ss:$16 sps:$4 sm:$0xff]  }
  0x71   :  { %1122 = vmatpush1.bf16.msra.mxu1 %v3230_v23  ;;  %1082 = vmatprep.subr.bf16.mxu0 %v3231_v24  ;;  %v3263_v45 = vld [vmem:[#allocation8 + $0x364] ss:$16 sps:$4 sm:$0xff]   ;;  %v3266_v50 = vld [vmem:[#allocation8 + $0x360] ss:$16 sps:$4 sm:$0xff]   ;;  %v3324_v23 = vld [vmem:[#allocation8 + $0x28c] ss:$16 sps:$4 sm:$0xff]  }
  0x72   :  { %1123 = vmatprep.subr.bf16.mxu1 %v3233_v25  ;;  %v286_v46 = vld [vmem:[#allocation5] sm:$0xff]  ;;  %v3319_v24 = vld [vmem:[#allocation8 + $0x88] ss:$16 sps:$4 sm:$0xff]  }
  0x73   :  { %v3941_v47 = vcombine.high %v286_v46, %v286_v46  ;;  %v3267_v52 = vld [vmem:[#allocation8 + $0x184] ss:$16 sps:$4 sm:$0xff]   ;;  %v3271_v54 = vld [vmem:[#allocation8 + $0x180] ss:$16 sps:$4 sm:$0xff]   ;;  %v3944_v6 = vcombine.low %v286_v46, %v286_v46  ;;  %v3322_v25 = vld [vmem:[#allocation8 + $0x288] ss:$16 sps:$4 sm:$0xff]  }
  0x74   :  { %1083 = vmatpush1.bf16.msra.mxu0 %v3235_v26  ;;  %v3269_v53 = vld [vmem:[#allocation8 + $0x384] ss:$16 sps:$4 sm:$0xff]   ;;  %v3272_v55 = vld [vmem:[#allocation8 + $0x380] ss:$16 sps:$4 sm:$0xff]   ;;  %v3327_v26 = vld [vmem:[#allocation8 + $0xac] ss:$16 sps:$4 sm:$0xff]  }
  0x75   :  { %1124 = vmatpush1.bf16.msra.mxu1 %v3236_v27  ;;  %1084 = vmatprep.subr.bf16.mxu0 %v3237_v28  ;;  %v3273_v56 = vld [vmem:[#allocation8 + $0x1a4] ss:$16 sps:$4 sm:$0xff]   ;;  %v3277_v58 = vld [vmem:[#allocation8 + $0x1a0] ss:$16 sps:$4 sm:$0xff]   ;;  %v3330_v27 = vld [vmem:[#allocation8 + $0x2ac] ss:$16 sps:$4 sm:$0xff]  }
  0x76   :  { %1125 = vmatprep.subr.bf16.mxu1 %v3239_v29  ;;  %1102 = vmatprep.mubr.bf16.mxu0 %v3941_v47  ;;  %v3275_v57 = vld [vmem:[#allocation8 + $0x3a4] ss:$16 sps:$4 sm:$0xff]   ;;  %v3278_v59 = vld [vmem:[#allocation8 + $0x3a0] ss:$16 sps:$4 sm:$0xff]   ;;  %v3325_v28 = vld [vmem:[#allocation8 + $0xa8] ss:$16 sps:$4 sm:$0xff]  }
  0x77   :  { %v3279_v60 = vld [vmem:[#allocation8 + $0x1c4] ss:$16 sps:$4 sm:$0xff]   ;;  %v3283_v62 = vld [vmem:[#allocation8 + $0x1c0] ss:$16 sps:$4 sm:$0xff]   ;;  %v3328_v29 = vld [vmem:[#allocation8 + $0x2a8] ss:$16 sps:$4 sm:$0xff]  }
  0x78   :  { %1085 = vmatpush1.bf16.msra.mxu0 %v3241_v30  ;;  %v3281_v61 = vld [vmem:[#allocation8 + $0x3c4] ss:$16 sps:$4 sm:$0xff]   ;;  %v3284_v63 = vld [vmem:[#allocation8 + $0x3c0] ss:$16 sps:$4 sm:$0xff]   ;;  %v3333_v30 = vld [vmem:[#allocation8 + $0xcc] ss:$16 sps:$4 sm:$0xff]  }
  0x79   :  { %1126 = vmatpush1.bf16.msra.mxu1 %v3242_v31  ;;  %1086 = vmatprep.subr.bf16.mxu0 %v3243_v32  ;;  %v3285_v0 = vld [vmem:[#allocation8 + $0x1e4] ss:$16 sps:$4 sm:$0xff]   ;;  %v3289_v2 = vld [vmem:[#allocation8 + $0x1e0] ss:$16 sps:$4 sm:$0xff]   ;;  %v3336_v31 = vld [vmem:[#allocation8 + $0x2cc] ss:$16 sps:$4 sm:$0xff]  }
  0x7a   :  { %1127 = vmatprep.subr.bf16.mxu1 %v3245_v33  ;;  %v3287_v1 = vld [vmem:[#allocation8 + $0x3e4] ss:$16 sps:$4 sm:$0xff]   ;;  %v3290_v3 = vld [vmem:[#allocation8 + $0x3e0] ss:$16 sps:$4 sm:$0xff]   ;;  %v3331_v32 = vld [vmem:[#allocation8 + $0xc8] ss:$16 sps:$4 sm:$0xff]  }
  0x7b   :  { %v3334_v33 = vld [vmem:[#allocation8 + $0x2c8] ss:$16 sps:$4 sm:$0xff]   ;;  %v3357_v46 = vld [vmem:[#allocation8 + $0x14c] ss:$16 sps:$4 sm:$0xff]  }
  0x7c   :  { %1087 = vmatpush1.bf16.msra.mxu0 %v3247_v34  ;;  %v3339_v34 = vld [vmem:[#allocation8 + $0xec] ss:$16 sps:$4 sm:$0xff]  }
  0x7d   :  { %1128 = vmatpush1.bf16.msra.mxu1 %v3248_v35  ;;  %1088 = vmatprep.subr.bf16.mxu0 %v3249_v36  ;;  %v3342_v35 = vld [vmem:[#allocation8 + $0x2ec] ss:$16 sps:$4 sm:$0xff]   ;;  %v3337_v36 = vld [vmem:[#allocation8 + $0xe8] ss:$16 sps:$4 sm:$0xff]  }
  0x7e   :  { %1129 = vmatprep.subr.bf16.mxu1 %v3251_v37  ;;  %v3340_v37 = vld [vmem:[#allocation8 + $0x2e8] ss:$16 sps:$4 sm:$0xff]  }
  0x80   :  { %1089 = vmatpush1.bf16.msra.mxu0 %v3253_v38  ;;  %v3345_v38 = vld [vmem:[#allocation8 + $0x10c] ss:$16 sps:$4 sm:$0xff]  }
  0x81   :  { %1130 = vmatpush1.bf16.msra.mxu1 %v3254_v39  ;;  %1090 = vmatprep.subr.bf16.mxu0 %v3255_v40  ;;  %v3348_v39 = vld [vmem:[#allocation8 + $0x30c] ss:$16 sps:$4 sm:$0xff]   ;;  %v3343_v40 = vld [vmem:[#allocation8 + $0x108] ss:$16 sps:$4 sm:$0xff]  }
  0x82   :  { %1131 = vmatprep.subr.bf16.mxu1 %v3257_v41  ;;  %v3346_v41 = vld [vmem:[#allocation8 + $0x308] ss:$16 sps:$4 sm:$0xff]  }
  0x84   :  { %1091 = vmatpush1.bf16.msra.mxu0 %v3259_v42  ;;  %v3351_v42 = vld [vmem:[#allocation8 + $0x12c] ss:$16 sps:$4 sm:$0xff]  }
  0x85   :  { %1132 = vmatpush1.bf16.msra.mxu1 %v3260_v43  ;;  %1092 = vmatprep.subr.bf16.mxu0 %v3261_v44  ;;  %v3354_v43 = vld [vmem:[#allocation8 + $0x32c] ss:$16 sps:$4 sm:$0xff]   ;;  %v3349_v44 = vld [vmem:[#allocation8 + $0x128] ss:$16 sps:$4 sm:$0xff]  }
  0x86   :  { %1133 = vmatprep.subr.bf16.mxu1 %v3263_v45  ;;  %v3352_v45 = vld [vmem:[#allocation8 + $0x328] ss:$16 sps:$4 sm:$0xff]  }
  0x88   :  { %1093 = vmatpush1.bf16.msra.mxu0 %v3265_v49  ;;  %v3358_v49 = vld [vmem:[#allocation8 + $0x348] ss:$16 sps:$4 sm:$0xff]  }
  0x89   :  { %1134 = vmatpush1.bf16.msra.mxu1 %v3266_v50  ;;  %1094 = vmatprep.subr.bf16.mxu0 %v3267_v52  ;;  %v3363_v50 = vld [vmem:[#allocation8 + $0x16c] ss:$16 sps:$4 sm:$0xff]   ;;  %v3361_v52 = vld [vmem:[#allocation8 + $0x168] ss:$16 sps:$4 sm:$0xff]  }
  0x8a   :  { %1135 = vmatprep.subr.bf16.mxu1 %v3269_v53  ;;  %v3364_v53 = vld [vmem:[#allocation8 + $0x368] ss:$16 sps:$4 sm:$0xff]  }
  0x8c   :  { %1095 = vmatpush1.bf16.msra.mxu0 %v3271_v54  ;;  %v3369_v54 = vld [vmem:[#allocation8 + $0x18c] ss:$16 sps:$4 sm:$0xff]  }
  0x8d   :  { %1136 = vmatpush1.bf16.msra.mxu1 %v3272_v55  ;;  %1096 = vmatprep.subr.bf16.mxu0 %v3273_v56  ;;  %v3372_v55 = vld [vmem:[#allocation8 + $0x38c] ss:$16 sps:$4 sm:$0xff]   ;;  %v3367_v56 = vld [vmem:[#allocation8 + $0x188] ss:$16 sps:$4 sm:$0xff]  }
  0x8e   :  { %1137 = vmatprep.subr.bf16.mxu1 %v3275_v57  ;;  %v3370_v57 = vld [vmem:[#allocation8 + $0x388] ss:$16 sps:$4 sm:$0xff]  }
  0x90   :  { %1097 = vmatpush1.bf16.msra.mxu0 %v3277_v58  ;;  %v3375_v58 = vld [vmem:[#allocation8 + $0x1ac] ss:$16 sps:$4 sm:$0xff]  }
  0x91   :  { %1138 = vmatpush1.bf16.msra.mxu1 %v3278_v59  ;;  %1098 = vmatprep.subr.bf16.mxu0 %v3279_v60  ;;  %v3378_v59 = vld [vmem:[#allocation8 + $0x3ac] ss:$16 sps:$4 sm:$0xff]   ;;  %v3373_v60 = vld [vmem:[#allocation8 + $0x1a8] ss:$16 sps:$4 sm:$0xff]  }
  0x92   :  { %1139 = vmatprep.subr.bf16.mxu1 %v3281_v61  ;;  %v3376_v61 = vld [vmem:[#allocation8 + $0x3a8] ss:$16 sps:$4 sm:$0xff]  }
  0x94   :  { %1099 = vmatpush1.bf16.msra.mxu0 %v3283_v62  ;;  %v3381_v62 = vld [vmem:[#allocation8 + $0x1cc] ss:$16 sps:$4 sm:$0xff]  }
  0x95   :  { %1140 = vmatpush1.bf16.msra.mxu1 %v3284_v63  ;;  %1100 = vmatprep.subr.bf16.mxu0 %v3285_v0  ;;  %v3384_v63 = vld [vmem:[#allocation8 + $0x3cc] ss:$16 sps:$4 sm:$0xff]   ;;  %v3379_v0 = vld [vmem:[#allocation8 + $0x1c8] ss:$16 sps:$4 sm:$0xff]  }
  0x96   :  { %1141 = vmatprep.subr.bf16.mxu1 %v3287_v1  ;;  %v3382_v1 = vld [vmem:[#allocation8 + $0x3c8] ss:$16 sps:$4 sm:$0xff]  }
  0x98   :  { %1101 = vmatpush1.bf16.msra.mxu0 %v3289_v2  ;;  %v3387_v2 = vld [vmem:[#allocation8 + $0x1ec] ss:$16 sps:$4 sm:$0xff]  }
  0x99   :  { %1142 = vmatpush1.bf16.msra.mxu1 %v3290_v3  ;;  %1152 = vmatprep.subr.bf16.mxu0 %v3297_v4  ;;  %v3390_v3 = vld [vmem:[#allocation8 + $0x3ec] ss:$16 sps:$4 sm:$0xff]   ;;  %v3385_v4 = vld [vmem:[#allocation8 + $0x1e8] ss:$16 sps:$4 sm:$0xff]  }
  0x9a   :  { %1193 = vmatprep.subr.bf16.mxu1 %v3300_v5  ;;  %v3388_v5 = vld [vmem:[#allocation8 + $0x3e8] ss:$16 sps:$4 sm:$0xff]  }
  0x9b   :  { %1103 = vmatmul.mubr.bf16.vlgmr.msra.gmra.mrb[0].mxu0 %v3944_v6 }
  0x9c   :  { %1144 = vmatmul.mubr.bf16.vlgmr.msra.gmra.mrb[0].mxu1 %v3946_v7  ;;  %1153 = vmatpush1.bf16.msra.mxu0 %v3295_v8  ;;  %v3393_v8 = vld [vmem:[#allocation7 + $0x4] ss:$16 sps:$4 sm:$0xff]  }
  0x9d   :  { %1194 = vmatpush1.bf16.msra.mxu1 %v3298_v9  ;;  %1154 = vmatprep.subr.bf16.mxu0 %v3303_v10  ;;  %v3396_v9 = vld [vmem:[#allocation7 + $0x204] ss:$16 sps:$4 sm:$0xff]   ;;  %v3391_v10 = vld [vmem:[#allocation7] ss:$16 sps:$4 sm:$0xff]  }
  0x9e   :  { %1195 = vmatprep.subr.bf16.mxu1 %v3306_v11  ;;  %1184 = vmatprep.mubr.bf16.mxu0 %v3941_v47  ;;  %v3360_v47 = vld [vmem:[#allocation8 + $0x34c] ss:$16 sps:$4 sm:$0xff]   ;;  %v3394_v11 = vld [vmem:[#allocation7 + $0x200] ss:$16 sps:$4 sm:$0xff]  }
  0x9f   :  { %1225 = vmatprep.mubr.bf16.mxu1 %v2723_v51  ;;  %v3366_v51 = vld [vmem:[#allocation8 + $0x36c] ss:$16 sps:$4 sm:$0xff]  }
  0xa0   :  { %1155 = vmatpush1.bf16.msra.mxu0 %v3301_v12  ;;  %v3399_v12 = vld [vmem:[#allocation7 + $0x24] ss:$16 sps:$4 sm:$0xff]  }
  0xa1   :  { %1196 = vmatpush1.bf16.msra.mxu1 %v3304_v13  ;;  %1156 = vmatprep.subr.bf16.mxu0 %v3309_v14  ;;  %v3402_v13 = vld [vmem:[#allocation7 + $0x224] ss:$16 sps:$4 sm:$0xff]   ;;  %v3951_v14 = vld [vmem:[#allocation2] sm:$0xff] }
  0xa2   :  { %1197 = vmatprep.subr.bf16.mxu1 %v3312_v15  ;;  %v3953_v15 = vld [vmem:[#allocation2 + $0x8] sm:$0xff] }
  0xa4   :  { %1157 = vmatpush1.bf16.msra.mxu0 %v3307_v16  ;;  %v3957_v16 = vcombine.high %v3951_v14, %v3951_v14 }
  0xa5   :  { %1198 = vmatpush1.bf16.msra.mxu1 %v3310_v17  ;;  %1158 = vmatprep.subr.bf16.mxu0 %v3315_v18  ;;  %v3961_v17 = vcombine.high %v3953_v15, %v3953_v15  ;;  %v3397_v18 = vld [vmem:[#allocation7 + $0x20] ss:$16 sps:$4 sm:$0xff]  }
  0xa6   :  { %1199 = vmatprep.subr.bf16.mxu1 %v3318_v19  ;;  %v3400_v19 = vld [vmem:[#allocation7 + $0x220] ss:$16 sps:$4 sm:$0xff]  }
  0xa8   :  { %1159 = vmatpush1.bf16.msra.mxu0 %v3313_v20  ;;  %v3405_v20 = vld [vmem:[#allocation7 + $0x44] ss:$16 sps:$4 sm:$0xff]  }
  0xa9   :  { %1200 = vmatpush1.bf16.msra.mxu1 %v3316_v21  ;;  %1160 = vmatprep.subr.bf16.mxu0 %v3321_v22  ;;  %v3408_v21 = vld [vmem:[#allocation7 + $0x244] ss:$16 sps:$4 sm:$0xff]   ;;  %v3403_v22 = vld [vmem:[#allocation7 + $0x40] ss:$16 sps:$4 sm:$0xff]  }
  0xaa   :  { %1201 = vmatprep.subr.bf16.mxu1 %v3324_v23  ;;  %v3406_v23 = vld [vmem:[#allocation7 + $0x240] ss:$16 sps:$4 sm:$0xff]  }
  0xac   :  { %1161 = vmatpush1.bf16.msra.mxu0 %v3319_v24  ;;  %v3411_v24 = vld [vmem:[#allocation7 + $0x64] ss:$16 sps:$4 sm:$0xff]  }
  0xad   :  { %1202 = vmatpush1.bf16.msra.mxu1 %v3322_v25  ;;  %1162 = vmatprep.subr.bf16.mxu0 %v3327_v26  ;;  %v3412_v25 = vld [vmem:[#allocation7 + $0x260] ss:$16 sps:$4 sm:$0xff]   ;;  %v3417_v26 = vld [vmem:[#allocation7 + $0x84] ss:$16 sps:$4 sm:$0xff]  }
  0xae   :  { %1203 = vmatprep.subr.bf16.mxu1 %v3330_v27  ;;  %v3420_v27 = vld [vmem:[#allocation7 + $0x284] ss:$16 sps:$4 sm:$0xff]  }
  0xb0   :  { %1163 = vmatpush1.bf16.msra.mxu0 %v3325_v28  ;;  %v3415_v28 = vld [vmem:[#allocation7 + $0x80] ss:$16 sps:$4 sm:$0xff]  }
  0xb1   :  { %1204 = vmatpush1.bf16.msra.mxu1 %v3328_v29  ;;  %1164 = vmatprep.subr.bf16.mxu0 %v3333_v30  ;;  %v3418_v29 = vld [vmem:[#allocation7 + $0x280] ss:$16 sps:$4 sm:$0xff]   ;;  %v3423_v30 = vld [vmem:[#allocation7 + $0xa4] ss:$16 sps:$4 sm:$0xff]  }
  0xb2   :  { %1205 = vmatprep.subr.bf16.mxu1 %v3336_v31  ;;  %v3426_v31 = vld [vmem:[#allocation7 + $0x2a4] ss:$16 sps:$4 sm:$0xff]  }
  0xb4   :  { %1165 = vmatpush1.bf16.msra.mxu0 %v3331_v32  ;;  %v3421_v32 = vld [vmem:[#allocation7 + $0xa0] ss:$16 sps:$4 sm:$0xff]  }
  0xb5   :  { %1206 = vmatpush1.bf16.msra.mxu1 %v3334_v33  ;;  %1166 = vmatprep.subr.bf16.mxu0 %v3339_v34  ;;  %v3424_v33 = vld [vmem:[#allocation7 + $0x2a0] ss:$16 sps:$4 sm:$0xff]   ;;  %v3429_v34 = vld [vmem:[#allocation7 + $0xc4] ss:$16 sps:$4 sm:$0xff]  }
  0xb6   :  { %1207 = vmatprep.subr.bf16.mxu1 %v3342_v35  ;;  %v3432_v35 = vld [vmem:[#allocation7 + $0x2c4] ss:$16 sps:$4 sm:$0xff]  }
  0xb8   :  { %1167 = vmatpush1.bf16.msra.mxu0 %v3337_v36  ;;  %v3427_v36 = vld [vmem:[#allocation7 + $0xc0] ss:$16 sps:$4 sm:$0xff]  }
  0xb9   :  { %1208 = vmatpush1.bf16.msra.mxu1 %v3340_v37  ;;  %1168 = vmatprep.subr.bf16.mxu0 %v3345_v38  ;;  %v3430_v37 = vld [vmem:[#allocation7 + $0x2c0] ss:$16 sps:$4 sm:$0xff]   ;;  %v3435_v38 = vld [vmem:[#allocation7 + $0xe4] ss:$16 sps:$4 sm:$0xff]  }
  0xba   :  { %1209 = vmatprep.subr.bf16.mxu1 %v3348_v39  ;;  %v3438_v39 = vld [vmem:[#allocation7 + $0x2e4] ss:$16 sps:$4 sm:$0xff]  }
  0xbc   :  { %1169 = vmatpush1.bf16.msra.mxu0 %v3343_v40  ;;  %v3433_v40 = vld [vmem:[#allocation7 + $0xe0] ss:$16 sps:$4 sm:$0xff]  }
  0xbd   :  { %1210 = vmatpush1.bf16.msra.mxu1 %v3346_v41  ;;  %1170 = vmatprep.subr.bf16.mxu0 %v3351_v42  ;;  %v3436_v41 = vld [vmem:[#allocation7 + $0x2e0] ss:$16 sps:$4 sm:$0xff]   ;;  %v3441_v42 = vld [vmem:[#allocation7 + $0x104] ss:$16 sps:$4 sm:$0xff]  }
  0xbe   :  { %1211 = vmatprep.subr.bf16.mxu1 %v3354_v43  ;;  %v3444_v43 = vld [vmem:[#allocation7 + $0x304] ss:$16 sps:$4 sm:$0xff]  }
  0xc0   :  { %1171 = vmatpush1.bf16.msra.mxu0 %v3349_v44  ;;  %v3439_v44 = vld [vmem:[#allocation7 + $0x100] ss:$16 sps:$4 sm:$0xff]  }
  0xc1   :  { %1212 = vmatpush1.bf16.msra.mxu1 %v3352_v45  ;;  %1172 = vmatprep.subr.bf16.mxu0 %v3357_v46  ;;  %v3442_v45 = vld [vmem:[#allocation7 + $0x300] ss:$16 sps:$4 sm:$0xff]   ;;  %v3447_v46 = vld [vmem:[#allocation7 + $0x124] ss:$16 sps:$4 sm:$0xff]  }
  0xc2   :  { %1213 = vmatprep.subr.bf16.mxu1 %v3360_v47  ;;  %v3450_v47 = vld [vmem:[#allocation7 + $0x324] ss:$16 sps:$4 sm:$0xff]  }
  0xc4   :  { %1173 = vmatpush1.bf16.msra.mxu0 %v3355_v48  ;;  %v3445_v48 = vld [vmem:[#allocation7 + $0x120] ss:$16 sps:$4 sm:$0xff]  }
  0xc5   :  { %1214 = vmatpush1.bf16.msra.mxu1 %v3358_v49  ;;  %1174 = vmatprep.subr.bf16.mxu0 %v3363_v50  ;;  %v3448_v49 = vld [vmem:[#allocation7 + $0x320] ss:$16 sps:$4 sm:$0xff]   ;;  %v3453_v50 = vld [vmem:[#allocation7 + $0x144] ss:$16 sps:$4 sm:$0xff]  }
  0xc6   :  { %1215 = vmatprep.subr.bf16.mxu1 %v3366_v51  ;;  %v3456_v51 = vld [vmem:[#allocation7 + $0x344] ss:$16 sps:$4 sm:$0xff]  }
  0xc8   :  { %1175 = vmatpush1.bf16.msra.mxu0 %v3361_v52  ;;  %v3451_v52 = vld [vmem:[#allocation7 + $0x140] ss:$16 sps:$4 sm:$0xff]  }
  0xc9   :  { %1216 = vmatpush1.bf16.msra.mxu1 %v3364_v53  ;;  %1176 = vmatprep.subr.bf16.mxu0 %v3369_v54  ;;  %v3454_v53 = vld [vmem:[#allocation7 + $0x340] ss:$16 sps:$4 sm:$0xff]   ;;  %v3459_v54 = vld [vmem:[#allocation7 + $0x164] ss:$16 sps:$4 sm:$0xff]  }
  0xca   :  { %1217 = vmatprep.subr.bf16.mxu1 %v3372_v55  ;;  %v3462_v55 = vld [vmem:[#allocation7 + $0x364] ss:$16 sps:$4 sm:$0xff]  }
  0xcc   :  { %1177 = vmatpush1.bf16.msra.mxu0 %v3367_v56  ;;  %v3457_v56 = vld [vmem:[#allocation7 + $0x160] ss:$16 sps:$4 sm:$0xff]  }
  0xcd   :  { %1218 = vmatpush1.bf16.msra.mxu1 %v3370_v57  ;;  %1178 = vmatprep.subr.bf16.mxu0 %v3375_v58  ;;  %v3460_v57 = vld [vmem:[#allocation7 + $0x360] ss:$16 sps:$4 sm:$0xff]   ;;  %v3465_v58 = vld [vmem:[#allocation7 + $0x184] ss:$16 sps:$4 sm:$0xff]  }
  0xce   :  { %1219 = vmatprep.subr.bf16.mxu1 %v3378_v59  ;;  %v3468_v59 = vld [vmem:[#allocation7 + $0x384] ss:$16 sps:$4 sm:$0xff]  }
  0xd0   :  { %1179 = vmatpush1.bf16.msra.mxu0 %v3373_v60  ;;  %v3463_v60 = vld [vmem:[#allocation7 + $0x180] ss:$16 sps:$4 sm:$0xff]  }
  0xd1   :  { %1220 = vmatpush1.bf16.msra.mxu1 %v3376_v61  ;;  %1180 = vmatprep.subr.bf16.mxu0 %v3381_v62  ;;  %v3466_v61 = vld [vmem:[#allocation7 + $0x380] ss:$16 sps:$4 sm:$0xff]   ;;  %v3471_v62 = vld [vmem:[#allocation7 + $0x1a4] ss:$16 sps:$4 sm:$0xff]  }
  0xd2   :  { %1221 = vmatprep.subr.bf16.mxu1 %v3384_v63  ;;  %v3474_v63 = vld [vmem:[#allocation7 + $0x3a4] ss:$16 sps:$4 sm:$0xff]  }
  0xd4   :  { %1181 = vmatpush1.bf16.msra.mxu0 %v3379_v0  ;;  %v3469_v0 = vld [vmem:[#allocation7 + $0x1a0] ss:$16 sps:$4 sm:$0xff]  }
  0xd5   :  { %1222 = vmatpush1.bf16.msra.mxu1 %v3382_v1  ;;  %1182 = vmatprep.subr.bf16.mxu0 %v3387_v2  ;;  %v3472_v1 = vld [vmem:[#allocation7 + $0x3a0] ss:$16 sps:$4 sm:$0xff]   ;;  %v3477_v2 = vld [vmem:[#allocation7 + $0x1c4] ss:$16 sps:$4 sm:$0xff]  }
  0xd6   :  { %1223 = vmatprep.subr.bf16.mxu1 %v3390_v3  ;;  %v3480_v3 = vld [vmem:[#allocation7 + $0x3c4] ss:$16 sps:$4 sm:$0xff]  }
  0xd8   :  { %1183 = vmatpush1.bf16.msra.mxu0 %v3385_v4  ;;  %v3475_v4 = vld [vmem:[#allocation7 + $0x1c0] ss:$16 sps:$4 sm:$0xff]  }
  0xd9   :  { %1224 = vmatpush1.bf16.msra.mxu1 %v3388_v5  ;;  %2215 = vmatprep.subr.bf16.mxu0 %v3393_v8  ;;  %v3478_v5 = vld [vmem:[#allocation7 + $0x3c0] ss:$16 sps:$4 sm:$0xff]   ;;  %v3483_v8 = vld [vmem:[#allocation7 + $0x1e4] ss:$16 sps:$4 sm:$0xff]  }
  0xda   :  { %2256 = vmatprep.subr.bf16.mxu1 %v3396_v9  ;;  %v3486_v9 = vld [vmem:[#allocation7 + $0x3e4] ss:$16 sps:$4 sm:$0xff]  }
  0xdb   :  { %1185 = vmatmul.mubr.bf16.vlgmr.msra.gmra.mrb[4].mxu0 %v3944_v6  ;;  %v3414_v6 = vld [vmem:[#allocation7 + $0x264] ss:$16 sps:$4 sm:$0xff]  }
  0xdc   :  { %1226 = vmatmul.mubr.bf16.vlgmr.msra.gmra.mrb[4].mxu1 %v3946_v7  ;;  %2216 = vmatpush1.bf16.msra.mxu0 %v3391_v10  ;;  %v3409_v7 = vld [vmem:[#allocation7 + $0x60] ss:$16 sps:$4 sm:$0xff]  }
  0xdd   :  { %2257 = vmatpush1.bf16.msra.mxu1 %v3394_v11  ;;  %2217 = vmatprep.subr.bf16.mxu0 %v3399_v12  ;;  %v3481_v10 = vld [vmem:[#allocation7 + $0x1e0] ss:$16 sps:$4 sm:$0xff]   ;;  %v3493_v12 = vld [vmem:[#allocation7 + $0x404] ss:$16 sps:$4 sm:$0xff]  }
  0xde   :  { %2258 = vmatprep.subr.bf16.mxu1 %v3402_v13  ;;  %2247 = vmatprep.mubr.bf16.mxu0 %v3957_v16  ;;  %v3484_v11 = vld [vmem:[#allocation7 + $0x3e0] ss:$16 sps:$4 sm:$0xff]   ;;  %v3496_v13 = vld [vmem:[#allocation7 + $0xc] ss:$16 sps:$4 sm:$0xff]  }
  0xdf   :  { %2288 = vmatprep.mubr.bf16.mxu1 %v3961_v17 }
  0xe0   :  { %2218 = vmatpush1.bf16.msra.mxu0 %v3397_v18  ;;  %v3491_v18 = vld [vmem:[#allocation7 + $0x400] ss:$16 sps:$4 sm:$0xff]  }
  0xe1   :  { %2259 = vmatpush1.bf16.msra.mxu1 %v3400_v19  ;;  %2219 = vmatprep.subr.bf16.mxu0 %v3405_v20  ;;  %v3969_v19 = vcombine.low %v3951_v14, %v3951_v14  ;;  %v3973_v20 = vcombine.low %v3953_v15, %v3953_v15  ;;  %v3497_v14 = vld [vmem:[#allocation7 + $0x420] ss:$16 sps:$4 sm:$0xff]   ;;  %v3500_v15 = vld [vmem:[#allocation7 + $0x28] ss:$16 sps:$4 sm:$0xff]  }
  0xe2   :  { %2260 = vmatprep.subr.bf16.mxu1 %v3408_v21  ;;  %v3975_v21 = vld [vmem:[#allocation2 + $0x10] sm:$0xff] }
  0xe4   :  { %2220 = vmatpush1.bf16.msra.mxu0 %v3403_v22  ;;  %v3494_v22 = vld [vmem:[#allocation7 + $0x8] ss:$16 sps:$4 sm:$0xff]  }
  0xe5   :  { %2261 = vmatpush1.bf16.msra.mxu1 %v3406_v23  ;;  %2221 = vmatprep.subr.bf16.mxu0 %v3411_v24  ;;  %v3499_v23 = vld [vmem:[#allocation7 + $0x424] ss:$16 sps:$4 sm:$0xff]   ;;  %v3502_v24 = vld [vmem:[#allocation7 + $0x2c] ss:$16 sps:$4 sm:$0xff]  }
  0xe6   :  { %2262 = vmatprep.subr.bf16.mxu1 %v3414_v6  ;;  %v3979_v6 = vcombine.high %v3975_v21, %v3975_v21 }
  0xe8   :  { %2222 = vmatpush1.bf16.msra.mxu0 %v3409_v7  ;;  %v3505_v7 = vld [vmem:[#allocation7 + $0x444] ss:$16 sps:$4 sm:$0xff]  }
  0xe9   :  { %2263 = vmatpush1.bf16.msra.mxu1 %v3412_v25  ;;  %2223 = vmatprep.subr.bf16.mxu0 %v3417_v26  ;;  %v3508_v25 = vld [vmem:[#allocation7 + $0x4c] ss:$16 sps:$4 sm:$0xff]   ;;  %v3503_v26 = vld [vmem:[#allocation7 + $0x440] ss:$16 sps:$4 sm:$0xff]  }
  0xea   :  { %2264 = vmatprep.subr.bf16.mxu1 %v3420_v27  ;;  %v3506_v27 = vld [vmem:[#allocation7 + $0x48] ss:$16 sps:$4 sm:$0xff]  }
  0xec   :  { %2224 = vmatpush1.bf16.msra.mxu0 %v3415_v28  ;;  %v3511_v28 = vld [vmem:[#allocation7 + $0x464] ss:$16 sps:$4 sm:$0xff]  }
  0xed   :  { %2265 = vmatpush1.bf16.msra.mxu1 %v3418_v29  ;;  %2225 = vmatprep.subr.bf16.mxu0 %v3423_v30  ;;  %v3514_v29 = vld [vmem:[#allocation7 + $0x6c] ss:$16 sps:$4 sm:$0xff]   ;;  %v3509_v30 = vld [vmem:[#allocation7 + $0x460] ss:$16 sps:$4 sm:$0xff]  }
  0xee   :  { %2266 = vmatprep.subr.bf16.mxu1 %v3426_v31  ;;  %v3512_v31 = vld [vmem:[#allocation7 + $0x68] ss:$16 sps:$4 sm:$0xff]  }
  0xf0   :  { %2226 = vmatpush1.bf16.msra.mxu0 %v3421_v32  ;;  %v3517_v32 = vld [vmem:[#allocation7 + $0x484] ss:$16 sps:$4 sm:$0xff]  }
  0xf1   :  { %2267 = vmatpush1.bf16.msra.mxu1 %v3424_v33  ;;  %2227 = vmatprep.subr.bf16.mxu0 %v3429_v34  ;;  %v3520_v33 = vld [vmem:[#allocation7 + $0x8c] ss:$16 sps:$4 sm:$0xff]   ;;  %v3515_v34 = vld [vmem:[#allocation7 + $0x480] ss:$16 sps:$4 sm:$0xff]  }
  0xf2   :  { %2268 = vmatprep.subr.bf16.mxu1 %v3432_v35  ;;  %v3523_v35 = vld [vmem:[#allocation7 + $0x4a4] ss:$16 sps:$4 sm:$0xff]  }
  0xf4   :  { %2228 = vmatpush1.bf16.msra.mxu0 %v3427_v36  ;;  %v3526_v36 = vld [vmem:[#allocation7 + $0xac] ss:$16 sps:$4 sm:$0xff]  }
  0xf5   :  { %2269 = vmatpush1.bf16.msra.mxu1 %v3430_v37  ;;  %2229 = vmatprep.subr.bf16.mxu0 %v3435_v38  ;;  %v3521_v37 = vld [vmem:[#allocation7 + $0x4a0] ss:$16 sps:$4 sm:$0xff]   ;;  %v3524_v38 = vld [vmem:[#allocation7 + $0xa8] ss:$16 sps:$4 sm:$0xff]  }
  0xf6   :  { %2270 = vmatprep.subr.bf16.mxu1 %v3438_v39  ;;  %v3529_v39 = vld [vmem:[#allocation7 + $0x4c4] ss:$16 sps:$4 sm:$0xff]  }
  0xf8   :  { %2230 = vmatpush1.bf16.msra.mxu0 %v3433_v40  ;;  %v3532_v40 = vld [vmem:[#allocation7 + $0xcc] ss:$16 sps:$4 sm:$0xff]  }
  0xf9   :  { %2271 = vmatpush1.bf16.msra.mxu1 %v3436_v41  ;;  %2231 = vmatprep.subr.bf16.mxu0 %v3441_v42  ;;  %v3527_v41 = vld [vmem:[#allocation7 + $0x4c0] ss:$16 sps:$4 sm:$0xff]   ;;  %v3530_v42 = vld [vmem:[#allocation7 + $0xc8] ss:$16 sps:$4 sm:$0xff]  }
  0xfa   :  { %2272 = vmatprep.subr.bf16.mxu1 %v3444_v43  ;;  %v3535_v43 = vld [vmem:[#allocation7 + $0x4e4] ss:$16 sps:$4 sm:$0xff]  }
  0xfc   :  { %2232 = vmatpush1.bf16.msra.mxu0 %v3439_v44  ;;  %v3538_v44 = vld [vmem:[#allocation7 + $0xec] ss:$16 sps:$4 sm:$0xff]  }
  0xfd   :  { %2273 = vmatpush1.bf16.msra.mxu1 %v3442_v45  ;;  %2233 = vmatprep.subr.bf16.mxu0 %v3447_v46  ;;  %v3533_v45 = vld [vmem:[#allocation7 + $0x4e0] ss:$16 sps:$4 sm:$0xff]   ;;  %v3536_v46 = vld [vmem:[#allocation7 + $0xe8] ss:$16 sps:$4 sm:$0xff]  }
  0xfe   :  { %2274 = vmatprep.subr.bf16.mxu1 %v3450_v47  ;;  %v3541_v47 = vld [vmem:[#allocation7 + $0x504] ss:$16 sps:$4 sm:$0xff]  }
 0x100   :  { %2234 = vmatpush1.bf16.msra.mxu0 %v3445_v48  ;;  %v3544_v48 = vld [vmem:[#allocation7 + $0x10c] ss:$16 sps:$4 sm:$0xff]  }
 0x101   :  { %2275 = vmatpush1.bf16.msra.mxu1 %v3448_v49  ;;  %2235 = vmatprep.subr.bf16.mxu0 %v3453_v50  ;;  %v3539_v49 = vld [vmem:[#allocation7 + $0x500] ss:$16 sps:$4 sm:$0xff]   ;;  %v3542_v50 = vld [vmem:[#allocation7 + $0x108] ss:$16 sps:$4 sm:$0xff]  }
 0x102   :  { %2276 = vmatprep.subr.bf16.mxu1 %v3456_v51  ;;  %v3547_v51 = vld [vmem:[#allocation7 + $0x524] ss:$16 sps:$4 sm:$0xff]  }
 0x104   :  { %2236 = vmatpush1.bf16.msra.mxu0 %v3451_v52  ;;  %v3550_v52 = vld [vmem:[#allocation7 + $0x12c] ss:$16 sps:$4 sm:$0xff]  }
 0x105   :  { %2277 = vmatpush1.bf16.msra.mxu1 %v3454_v53  ;;  %2237 = vmatprep.subr.bf16.mxu0 %v3459_v54  ;;  %v3545_v53 = vld [vmem:[#allocation7 + $0x520] ss:$16 sps:$4 sm:$0xff]   ;;  %v3548_v54 = vld [vmem:[#allocation7 + $0x128] ss:$16 sps:$4 sm:$0xff]  }
 0x106   :  { %2278 = vmatprep.subr.bf16.mxu1 %v3462_v55  ;;  %v3553_v55 = vld [vmem:[#allocation7 + $0x544] ss:$16 sps:$4 sm:$0xff]  }
 0x108   :  { %2238 = vmatpush1.bf16.msra.mxu0 %v3457_v56  ;;  %v3556_v56 = vld [vmem:[#allocation7 + $0x14c] ss:$16 sps:$4 sm:$0xff]  }
 0x109   :  { %2279 = vmatpush1.bf16.msra.mxu1 %v3460_v57  ;;  %2239 = vmatprep.subr.bf16.mxu0 %v3465_v58  ;;  %v3551_v57 = vld [vmem:[#allocation7 + $0x540] ss:$16 sps:$4 sm:$0xff]   ;;  %v3554_v58 = vld [vmem:[#allocation7 + $0x148] ss:$16 sps:$4 sm:$0xff]  }
 0x10a   :  { %2280 = vmatprep.subr.bf16.mxu1 %v3468_v59  ;;  %v3559_v59 = vld [vmem:[#allocation7 + $0x564] ss:$16 sps:$4 sm:$0xff]  }
 0x10c   :  { %2240 = vmatpush1.bf16.msra.mxu0 %v3463_v60  ;;  %v3562_v60 = vld [vmem:[#allocation7 + $0x16c] ss:$16 sps:$4 sm:$0xff]  }
 0x10d   :  { %2281 = vmatpush1.bf16.msra.mxu1 %v3466_v61  ;;  %2241 = vmatprep.subr.bf16.mxu0 %v3471_v62  ;;  %v3557_v61 = vld [vmem:[#allocation7 + $0x560] ss:$16 sps:$4 sm:$0xff]   ;;  %v3560_v62 = vld [vmem:[#allocation7 + $0x168] ss:$16 sps:$4 sm:$0xff]  }
 0x10e   :  { %2282 = vmatprep.subr.bf16.mxu1 %v3474_v63  ;;  %v3565_v63 = vld [vmem:[#allocation7 + $0x584] ss:$16 sps:$4 sm:$0xff]  }
 0x110   :  { %2242 = vmatpush1.bf16.msra.mxu0 %v3469_v0  ;;  %v3568_v0 = vld [vmem:[#allocation7 + $0x18c] ss:$16 sps:$4 sm:$0xff]  }
 0x111   :  { %2283 = vmatpush1.bf16.msra.mxu1 %v3472_v1  ;;  %2243 = vmatprep.subr.bf16.mxu0 %v3477_v2  ;;  %v3563_v1 = vld [vmem:[#allocation7 + $0x580] ss:$16 sps:$4 sm:$0xff]   ;;  %v3566_v2 = vld [vmem:[#allocation7 + $0x188] ss:$16 sps:$4 sm:$0xff]  }
 0x112   :  { %2284 = vmatprep.subr.bf16.mxu1 %v3480_v3  ;;  %v3571_v3 = vld [vmem:[#allocation7 + $0x5a4] ss:$16 sps:$4 sm:$0xff]  }
 0x114   :  { %2244 = vmatpush1.bf16.msra.mxu0 %v3475_v4  ;;  %v3574_v4 = vld [vmem:[#allocation7 + $0x1ac] ss:$16 sps:$4 sm:$0xff]  }
 0x115   :  { %2285 = vmatpush1.bf16.msra.mxu1 %v3478_v5  ;;  %2245 = vmatprep.subr.bf16.mxu0 %v3483_v8  ;;  %v3569_v5 = vld [vmem:[#allocation7 + $0x5a0] ss:$16 sps:$4 sm:$0xff]   ;;  %v3572_v8 = vld [vmem:[#allocation7 + $0x1a8] ss:$16 sps:$4 sm:$0xff]  }
 0x116   :  { %2286 = vmatprep.subr.bf16.mxu1 %v3486_v9  ;;  %v3577_v9 = vld [vmem:[#allocation7 + $0x5c4] ss:$16 sps:$4 sm:$0xff]  }
 0x118   :  { %2246 = vmatpush1.bf16.msra.mxu0 %v3481_v10  ;;  %v3580_v10 = vld [vmem:[#allocation7 + $0x1cc] ss:$16 sps:$4 sm:$0xff]  }
 0x119   :  { %2287 = vmatpush1.bf16.msra.mxu1 %v3484_v11  ;;  %2297 = vmatprep.subr.bf16.mxu0 %v3493_v12  ;;  %v3575_v11 = vld [vmem:[#allocation7 + $0x5c0] ss:$16 sps:$4 sm:$0xff]   ;;  %v3578_v12 = vld [vmem:[#allocation7 + $0x1c8] ss:$16 sps:$4 sm:$0xff]  }
 0x11a   :  { %2338 = vmatprep.subr.bf16.mxu1 %v3496_v13  ;;  %v3583_v13 = vld [vmem:[#allocation7 + $0x5e4] ss:$16 sps:$4 sm:$0xff]  }
 0x11b   :  { %2248 = vmatmul.mubr.bf16.vlgmr.msra.gmra.mrb[8].mxu0 %v3969_v19 }
 0x11c   :  { %2289 = vmatmul.mubr.bf16.vlgmr.msra.gmra.mrb[8].mxu1 %v3973_v20  ;;  %2298 = vmatpush1.bf16.msra.mxu0 %v3491_v18  ;;  %v3586_v18 = vld [vmem:[#allocation7 + $0x1ec] ss:$16 sps:$4 sm:$0xff]  }
 0x11d   :  { %2339 = vmatpush1.bf16.msra.mxu1 %v3494_v22  ;;  %2299 = vmatprep.subr.bf16.mxu0 %v3499_v23  ;;  %v3581_v22 = vld [vmem:[#allocation7 + $0x5e0] ss:$16 sps:$4 sm:$0xff]   ;;  %v3584_v23 = vld [vmem:[#allocation7 + $0x1e8] ss:$16 sps:$4 sm:$0xff]  }
 0x11e   :  { %2340 = vmatprep.subr.bf16.mxu1 %v3502_v24  ;;  %2329 = vmatprep.mubr.bf16.mxu0 %v3979_v6  ;;  %v3591_v24 = vld [vmem:[#allocation7 + $0x20c] ss:$16 sps:$4 sm:$0xff]  }
 0x11f   :  { %2370 = vmatprep.mubr.bf16.mxu1 %v3957_v16  ;;  %v3518_v16 = vld [vmem:[#allocation7 + $0x88] ss:$16 sps:$4 sm:$0xff]  }
 0x120   :  { %2300 = vmatpush1.bf16.msra.mxu0 %v3497_v14  ;;  %v3594_v14 = vld [vmem:[#allocation7 + $0x40c] ss:$16 sps:$4 sm:$0xff]  }
 0x121   :  { %2341 = vmatpush1.bf16.msra.mxu1 %v3500_v15  ;;  %2301 = vmatprep.subr.bf16.mxu0 %v3505_v7  ;;  %v3987_v15 = vcombine.low %v3975_v21, %v3975_v21  ;;  %v3589_v7 = vld [vmem:[#allocation7 + $0x208] ss:$16 sps:$4 sm:$0xff]   ;;  %v3603_v21 = vld [vmem:[#allocation7 + $0x24c] ss:$16 sps:$4 sm:$0xff]  }
 0x122   :  { %2342 = vmatprep.subr.bf16.mxu1 %v3508_v25  ;;  %v3592_v25 = vld [vmem:[#allocation7 + $0x408] ss:$16 sps:$4 sm:$0xff]  }
 0x124   :  { %2302 = vmatpush1.bf16.msra.mxu0 %v3503_v26  ;;  %v3597_v26 = vld [vmem:[#allocation7 + $0x22c] ss:$16 sps:$4 sm:$0xff]  }
 0x125   :  { %2343 = vmatpush1.bf16.msra.mxu1 %v3506_v27  ;;  %2303 = vmatprep.subr.bf16.mxu0 %v3511_v28  ;;  %v3600_v27 = vld [vmem:[#allocation7 + $0x42c] ss:$16 sps:$4 sm:$0xff]   ;;  %v3595_v28 = vld [vmem:[#allocation7 + $0x228] ss:$16 sps:$4 sm:$0xff]  }
 0x126   :  { %2344 = vmatprep.subr.bf16.mxu1 %v3514_v29  ;;  %v3598_v29 = vld [vmem:[#allocation7 + $0x428] ss:$16 sps:$4 sm:$0xff]  }
 0x128   :  { %2304 = vmatpush1.bf16.msra.mxu0 %v3509_v30  ;;  %v3606_v30 = vld [vmem:[#allocation7 + $0x44c] ss:$16 sps:$4 sm:$0xff]  }
 0x129   :  { %2345 = vmatpush1.bf16.msra.mxu1 %v3512_v31  ;;  %2305 = vmatprep.subr.bf16.mxu0 %v3517_v32  ;;  %v3601_v31 = vld [vmem:[#allocation7 + $0x248] ss:$16 sps:$4 sm:$0xff]  }
 0x12a   :  { %2346 = vmatprep.subr.bf16.mxu1 %v3520_v33  ;;  %v3604_v32 = vld [vmem:[#allocation7 + $0x448] ss:$16 sps:$4 sm:$0xff]   ;;  %v3609_v33 = vld [vmem:[#allocation7 + $0x26c] ss:$16 sps:$4 sm:$0xff]  }
 0x12c   :  { %2306 = vmatpush1.bf16.msra.mxu0 %v3515_v34  ;;  %v3607_v34 = vld [vmem:[#allocation7 + $0x268] ss:$16 sps:$4 sm:$0xff]  }
 0x12d   :  { %2347 = vmatpush1.bf16.msra.mxu1 %v3518_v16  ;;  %2307 = vmatprep.subr.bf16.mxu0 %v3523_v35  ;;  %v3610_v16 = vld [vmem:[#allocation7 + $0x468] ss:$16 sps:$4 sm:$0xff]   ;;  %v3615_v35 = vld [vmem:[#allocation7 + $0x28c] ss:$16 sps:$4 sm:$0xff]  }
 0x12e   :  { %2348 = vmatprep.subr.bf16.mxu1 %v3526_v36  ;;  %v3618_v36 = vld [vmem:[#allocation7 + $0x48c] ss:$16 sps:$4 sm:$0xff]  }
 0x130   :  { %2308 = vmatpush1.bf16.msra.mxu0 %v3521_v37  ;;  %v3621_v37 = vld [vmem:[#allocation7 + $0x2ac] ss:$16 sps:$4 sm:$0xff]  }
 0x131   :  { %2349 = vmatpush1.bf16.msra.mxu1 %v3524_v38  ;;  %2309 = vmatprep.subr.bf16.mxu0 %v3529_v39  ;;  %v3624_v38 = vld [vmem:[#allocation7 + $0x4ac] ss:$16 sps:$4 sm:$0xff]   ;;  %v3619_v39 = vld [vmem:[#allocation7 + $0x2a8] ss:$16 sps:$4 sm:$0xff]  }
 0x132   :  { %2350 = vmatprep.subr.bf16.mxu1 %v3532_v40  ;;  %v3622_v40 = vld [vmem:[#allocation7 + $0x4a8] ss:$16 sps:$4 sm:$0xff]  }
 0x134   :  { %2310 = vmatpush1.bf16.msra.mxu0 %v3527_v41  ;;  %v3627_v41 = vld [vmem:[#allocation7 + $0x2cc] ss:$16 sps:$4 sm:$0xff]  }
 0x135   :  { %2351 = vmatpush1.bf16.msra.mxu1 %v3530_v42  ;;  %2311 = vmatprep.subr.bf16.mxu0 %v3535_v43  ;;  %v3630_v42 = vld [vmem:[#allocation7 + $0x4cc] ss:$16 sps:$4 sm:$0xff]  }
 0x136   :  { %2352 = vmatprep.subr.bf16.mxu1 %v3538_v44 }
 0x138   :  { %2312 = vmatpush1.bf16.msra.mxu0 %v3533_v45 }
 0x139   :  { %2353 = vmatpush1.bf16.msra.mxu1 %v3536_v46  ;;  %2313 = vmatprep.subr.bf16.mxu0 %v3541_v47 }
 0x13a   :  { %2354 = vmatprep.subr.bf16.mxu1 %v3544_v48 }
 0x13c   :  { %2314 = vmatpush1.bf16.msra.mxu0 %v3539_v49 }
 0x13d   :  { %2355 = vmatpush1.bf16.msra.mxu1 %v3542_v50  ;;  %2315 = vmatprep.subr.bf16.mxu0 %v3547_v51  ;;  %v3625_v51 = vld [vmem:[#allocation7 + $0x2c8] ss:$16 sps:$4 sm:$0xff]  }
 0x13e   :  { %2356 = vmatprep.subr.bf16.mxu1 %v3550_v52  ;;  %v3628_v52 = vld [vmem:[#allocation7 + $0x4c8] ss:$16 sps:$4 sm:$0xff]  }
 0x140   :  { %2316 = vmatpush1.bf16.msra.mxu0 %v3545_v53 }
 0x141   :  { %2357 = vmatpush1.bf16.msra.mxu1 %v3548_v54  ;;  %2317 = vmatprep.subr.bf16.mxu0 %v3553_v55  ;;  %v3633_v55 = vld [vmem:[#allocation7 + $0x2ec] ss:$16 sps:$4 sm:$0xff]  }
 0x142   :  { %2358 = vmatprep.subr.bf16.mxu1 %v3556_v56  ;;  %v3636_v56 = vld [vmem:[#allocation7 + $0x4ec] ss:$16 sps:$4 sm:$0xff]  }
 0x144   :  { %2318 = vmatpush1.bf16.msra.mxu0 %v3551_v57  ;;  %v3631_v57 = vld [vmem:[#allocation7 + $0x2e8] ss:$16 sps:$4 sm:$0xff]  }
 0x145   :  { %2359 = vmatpush1.bf16.msra.mxu1 %v3554_v58  ;;  %2319 = vmatprep.subr.bf16.mxu0 %v3559_v59  ;;  %v3634_v58 = vld [vmem:[#allocation7 + $0x4e8] ss:$16 sps:$4 sm:$0xff]   ;;  %v3639_v59 = vld [vmem:[#allocation7 + $0x30c] ss:$16 sps:$4 sm:$0xff]  }
 0x146   :  { %2360 = vmatprep.subr.bf16.mxu1 %v3562_v60  ;;  %v3642_v60 = vld [vmem:[#allocation7 + $0x50c] ss:$16 sps:$4 sm:$0xff]  }
 0x148   :  { %2320 = vmatpush1.bf16.msra.mxu0 %v3557_v61  ;;  %v3637_v61 = vld [vmem:[#allocation7 + $0x308] ss:$16 sps:$4 sm:$0xff]  }
 0x149   :  { %2361 = vmatpush1.bf16.msra.mxu1 %v3560_v62  ;;  %2321 = vmatprep.subr.bf16.mxu0 %v3565_v63  ;;  %v3640_v62 = vld [vmem:[#allocation7 + $0x508] ss:$16 sps:$4 sm:$0xff]   ;;  %v3645_v63 = vld [vmem:[#allocation7 + $0x32c] ss:$16 sps:$4 sm:$0xff]  }
 0x14a   :  { %2362 = vmatprep.subr.bf16.mxu1 %v3568_v0  ;;  %v3648_v0 = vld [vmem:[#allocation7 + $0x52c] ss:$16 sps:$4 sm:$0xff]  }
 0x14c   :  { %2322 = vmatpush1.bf16.msra.mxu0 %v3563_v1  ;;  %v3643_v1 = vld [vmem:[#allocation7 + $0x328] ss:$16 sps:$4 sm:$0xff]  }
 0x14d   :  { %2363 = vmatpush1.bf16.msra.mxu1 %v3566_v2  ;;  %2323 = vmatprep.subr.bf16.mxu0 %v3571_v3  ;;  %v3646_v2 = vld [vmem:[#allocation7 + $0x528] ss:$16 sps:$4 sm:$0xff]   ;;  %v3651_v3 = vld [vmem:[#allocation7 + $0x34c] ss:$16 sps:$4 sm:$0xff]  }
 0x14e   :  { %2364 = vmatprep.subr.bf16.mxu1 %v3574_v4  ;;  %v3654_v4 = vld [vmem:[#allocation7 + $0x54c] ss:$16 sps:$4 sm:$0xff]  }
 0x150   :  { %2324 = vmatpush1.bf16.msra.mxu0 %v3569_v5  ;;  %v3649_v5 = vld [vmem:[#allocation7 + $0x348] ss:$16 sps:$4 sm:$0xff]  }
 0x151   :  { %2365 = vmatpush1.bf16.msra.mxu1 %v3572_v8  ;;  %2325 = vmatprep.subr.bf16.mxu0 %v3577_v9  ;;  %v3652_v8 = vld [vmem:[#allocation7 + $0x548] ss:$16 sps:$4 sm:$0xff]   ;;  %v3657_v9 = vld [vmem:[#allocation7 + $0x36c] ss:$16 sps:$4 sm:$0xff]  }
 0x152   :  { %2366 = vmatprep.subr.bf16.mxu1 %v3580_v10  ;;  %v3660_v10 = vld [vmem:[#allocation7 + $0x56c] ss:$16 sps:$4 sm:$0xff]  }
 0x154   :  { %2326 = vmatpush1.bf16.msra.mxu0 %v3575_v11  ;;  %v3655_v11 = vld [vmem:[#allocation7 + $0x368] ss:$16 sps:$4 sm:$0xff]  }
 0x155   :  { %2367 = vmatpush1.bf16.msra.mxu1 %v3578_v12  ;;  %2327 = vmatprep.subr.bf16.mxu0 %v3583_v13  ;;  %v3658_v12 = vld [vmem:[#allocation7 + $0x568] ss:$16 sps:$4 sm:$0xff]   ;;  %v3663_v13 = vld [vmem:[#allocation7 + $0x38c] ss:$16 sps:$4 sm:$0xff]  }
 0x156   :  { %2368 = vmatprep.subr.bf16.mxu1 %v3586_v18  ;;  %v3666_v18 = vld [vmem:[#allocation7 + $0x58c] ss:$16 sps:$4 sm:$0xff]  }
 0x158   :  { %2328 = vmatpush1.bf16.msra.mxu0 %v3581_v22  ;;  %v3661_v22 = vld [vmem:[#allocation7 + $0x388] ss:$16 sps:$4 sm:$0xff]  }
 0x159   :  { %2369 = vmatpush1.bf16.msra.mxu1 %v3584_v23  ;;  %2379 = vmatprep.subr.bf16.mxu0 %v3591_v24  ;;  %v3664_v23 = vld [vmem:[#allocation7 + $0x588] ss:$16 sps:$4 sm:$0xff]   ;;  %v3669_v24 = vld [vmem:[#allocation7 + $0x3ac] ss:$16 sps:$4 sm:$0xff]  }
 0x15a   :  { %2420 = vmatprep.subr.bf16.mxu1 %v3594_v14  ;;  %v3672_v14 = vld [vmem:[#allocation7 + $0x5ac] ss:$16 sps:$4 sm:$0xff]  }
 0x15b   :  { %2330 = vmatmul.mubr.bf16.vlgmr.msra.gmra.mrb[12].mxu0 %v3987_v15 }
 0x15c   :  { %2371 = vmatmul.mubr.bf16.vlgmr.msra.gmra.mrb[12].mxu1 %v3969_v19  ;;  %2380 = vmatpush1.bf16.msra.mxu0 %v3589_v7  ;;  %v3612_v19 = vld [vmem:[#allocation7 + $0x46c] ss:$16 sps:$4 sm:$0xff]   ;;  %v3667_v7 = vld [vmem:[#allocation7 + $0x3a8] ss:$16 sps:$4 sm:$0xff]  }
 0x15d   :  { %2421 = vmatpush1.bf16.msra.mxu1 %v3592_v25  ;;  %2381 = vmatprep.subr.bf16.mxu0 %v3597_v26  ;;  %v3670_v25 = vld [vmem:[#allocation7 + $0x5a8] ss:$16 sps:$4 sm:$0xff]   ;;  %v3675_v26 = vld [vmem:[#allocation7 + $0x3cc] ss:$16 sps:$4 sm:$0xff]  }
 0x15e   :  { %2422 = vmatprep.subr.bf16.mxu1 %v3600_v27  ;;  %2411 = vmatprep.mubr.bf16.mxu0 %v3961_v17  ;;  %v3613_v17 = vld [vmem:[#allocation7 + $0x288] ss:$16 sps:$4 sm:$0xff]   ;;  %v3678_v27 = vld [vmem:[#allocation7 + $0x5cc] ss:$16 sps:$4 sm:$0xff]  }
 0x15f   :  { %2452 = vmatprep.mubr.bf16.mxu1 %v3979_v6  ;;  %v3616_v6 = vld [vmem:[#allocation7 + $0x488] ss:$16 sps:$4 sm:$0xff]  }
 0x160   :  { %2382 = vmatpush1.bf16.msra.mxu0 %v3595_v28  ;;  %v3673_v28 = vld [vmem:[#allocation7 + $0x3c8] ss:$16 sps:$4 sm:$0xff]  }
 0x161   :  { %2423 = vmatpush1.bf16.msra.mxu1 %v3598_v29  ;;  %2383 = vmatprep.subr.bf16.mxu0 %v3603_v21  ;;  %v3676_v29 = vld [vmem:[#allocation7 + $0x5c8] ss:$16 sps:$4 sm:$0xff]   ;;  %v3681_v21 = vld [vmem:[#allocation7 + $0x3ec] ss:$16 sps:$4 sm:$0xff]  }
 0x162   :  { %2424 = vmatprep.subr.bf16.mxu1 %v3606_v30  ;;  %v3684_v30 = vld [vmem:[#allocation7 + $0x5ec] ss:$16 sps:$4 sm:$0xff]  }
 0x164   :  { %2384 = vmatpush1.bf16.msra.mxu0 %v3601_v31  ;;  %v2507_v31 = vld [vmem:[#allocation10 + $0x80] sm:$0xff] }
 0x165   :  { %2425 = vmatpush1.bf16.msra.mxu1 %v3604_v32  ;;  %2385 = vmatprep.subr.bf16.mxu0 %v3609_v33  ;;  %v2508_v32 = vld [vmem:[#allocation10 + $0x88] sm:$0xff] }
 0x166   :  { %2426 = vmatprep.subr.bf16.mxu1 %v3612_v19  ;;  %v3679_v33 = vld [vmem:[#allocation7 + $0x3e8] ss:$16 sps:$4 sm:$0xff]  }
 0x167   :  { %v3682_v19 = vld [vmem:[#allocation7 + $0x5e8] ss:$16 sps:$4 sm:$0xff]  }
 0x168   :  { %2386 = vmatpush1.bf16.msra.mxu0 %v3607_v34  ;;  %v3121_v34 = vpack.c.bf16 %v2508_v32, %v2507_v31  ;;  %v2523_v31 = vld [vmem:[#allocation10 + $0x100] sm:$0xff] }
 0x169   :  { %2427 = vmatpush1.bf16.msra.mxu1 %v3610_v16  ;;  %2387 = vmatprep.subr.bf16.mxu0 %v3615_v35  ;;  %v2491_v16 = vld [vmem:[#allocation10] sm:$0xff]  ;;  %v2492_v35 = vld [vmem:[#allocation10 + $0x8] sm:$0xff] }
 0x16a   :  { %2428 = vmatprep.subr.bf16.mxu1 %v3618_v36  ;;  %v2509_v36 = vld [vmem:[#allocation10 + $0x90] sm:$0xff] }
 0x16c   :  { %2388 = vmatpush1.bf16.msra.mxu0 %v3613_v17  ;;  %v2510_v17 = vld [vmem:[#allocation10 + $0x98] sm:$0xff] }
 0x16d   :  { %2429 = vmatpush1.bf16.msra.mxu1 %v3616_v6  ;;  %2389 = vmatprep.subr.bf16.mxu0 %v3621_v37  ;;  %v3123_v6 = vpack.c.bf16 %v2492_v35, %v2491_v16  ;;  %v3125_v37 = vpack.c.bf16 %v2510_v17, %v2509_v36  ;;  %v2525_v36 = vld [vmem:[#allocation10 + $0x110] sm:$0xff]  ;;  %v2526_v17 = vld [vmem:[#allocation10 + $0x118] sm:$0xff] }
 0x16e   :  { %2430 = vmatprep.subr.bf16.mxu1 %v3624_v38  ;;  %v1104_v43 = vpop.f32.mrb[0].mxu0  ;;  %v2493_v38 = vld [vmem:[#allocation10 + $0x10] sm:$0xff] }
 0x16f   :  { %v1145_v44 = vpop.f32.mrb[0].mxu1  ;;  %v1106_v46 = vpop.f32.mrb[1].mxu0 }
 0x170   :  { %v3993_v45 = vadd.f32 %v1145_v44, %v1104_v43  ;;  %v1147_v47 = vpop.f32.mrb[1].mxu1  ;;  %v1108_v49 = vpop.f32.mrb[2].mxu0  ;;  %2390 = vmatpush1.bf16.msra.mxu0 %v3619_v39  ;;  %v2494_v39 = vld [vmem:[#allocation10 + $0x18] sm:$0xff]  ;;  %v2495_v44 = vld [vmem:[#allocation10 + $0x20] sm:$0xff] }
 0x171   :  { %v3995_v48 = vadd.f32 %v1147_v47, %v1106_v46  ;;  %v1149_v50 = vpop.f32.mrb[2].mxu1  ;;  %2431 = vmatpush1.bf16.msra.mxu1 %v3622_v40  ;;  %v1109_v53 = vpop.f32.mrb[3].mxu0  ;;  %2391 = vmatprep.subr.bf16.mxu0 %v3627_v41  ;;  %v2511_v40 = vld [vmem:[#allocation10 + $0xa0] sm:$0xff]  ;;  %v2512_v41 = vld [vmem:[#allocation10 + $0xa8] sm:$0xff]  ;;  %v2513_v47 = vld [vmem:[#allocation10 + $0xb0] sm:$0xff] }
 0x172   :  { %v1150_v54 = vpop.f32.mrb[3].mxu1  ;;  %2432 = vmatprep.subr.bf16.mxu1 %v3630_v42  ;;  %v3127_v42 = vpack.c.bf16 %v2494_v39, %v2493_v38  ;;  %v3129_v43 = vpack.c.bf16 %v2512_v41, %v2511_v40  ;;  %v2496_v46 = vld [vmem:[#allocation10 + $0x28] sm:$0xff]  ;;  %v2514_v49 = vld [vmem:[#allocation10 + $0xb8] sm:$0xff]  ;;  %v3159_v38 = vpack.c.bf16 %v2526_v17, %v2525_v36  ;;  %v2527_v40 = vld [vmem:[#allocation10 + $0x120] sm:$0xff] }
 0x173   :  { %v3131_v50 = vpack.c.bf16 %v2496_v46, %v2495_v44  ;;  %v2498_v53 = vld [vmem:[#allocation10 + $0x38] sm:$0xff]  ;;  %v2515_v54 = vld [vmem:[#allocation10 + $0xc0] sm:$0xff]  ;;  %v2528_v41 = vld [vmem:[#allocation10 + $0x128] sm:$0xff] }
 0x174   :  { %2392 = vmatpush1.bf16.msra.mxu0 %v3625_v51  ;;  %v3133_v51 = vpack.c.bf16 %v2514_v49, %v2513_v47  ;;  %v3163_v44 = vpack.c.bf16 %v2528_v41, %v2527_v40  ;;  %v2529_v47 = vld [vmem:[#allocation10 + $0x130] sm:$0xff]  ;;  %v2530_v49 = vld [vmem:[#allocation10 + $0x138] sm:$0xff] }
 0x175   :  { %2433 = vmatpush1.bf16.msra.mxu1 %v3628_v52  ;;  %2393 = vmatprep.subr.bf16.mxu0 %v3633_v55  ;;  %v2497_v52 = vld [vmem:[#allocation10 + $0x30] sm:$0xff]  ;;  %v2516_v55 = vld [vmem:[#allocation10 + $0xc8] sm:$0xff] }
 0x176   :  { %2434 = vmatprep.subr.bf16.mxu1 %v3636_v56  ;;  %v2499_v56 = vld [vmem:[#allocation10 + $0x40] sm:$0xff] }
 0x178   :  { %2394 = vmatpush1.bf16.msra.mxu0 %v3631_v57  ;;  %v2500_v57 = vld [vmem:[#allocation10 + $0x48] sm:$0xff] }
 0x179   :  { %2435 = vmatpush1.bf16.msra.mxu1 %v3634_v58  ;;  %2395 = vmatprep.subr.bf16.mxu0 %v3639_v59  ;;  %v2517_v58 = vld [vmem:[#allocation10 + $0xd0] sm:$0xff]  ;;  %v2518_v59 = vld [vmem:[#allocation10 + $0xd8] sm:$0xff] }
 0x17a   :  { %2436 = vmatprep.subr.bf16.mxu1 %v3642_v60  ;;  %v3139_v60 = vpack.c.bf16 %v2500_v57, %v2499_v56 }
 0x17c   :  { %2396 = vmatpush1.bf16.msra.mxu0 %v3637_v61  ;;  %v3141_v61 = vpack.c.bf16 %v2518_v59, %v2517_v58  ;;  %v2533_v58 = vld [vmem:[#allocation10 + $0x150] sm:$0xff]  ;;  %v2534_v59 = vld [vmem:[#allocation10 + $0x158] sm:$0xff] }
 0x17d   :  { %2437 = vmatpush1.bf16.msra.mxu1 %v3640_v62  ;;  %2397 = vmatprep.subr.bf16.mxu0 %v3645_v63  ;;  %v2501_v62 = vld [vmem:[#allocation10 + $0x50] sm:$0xff]  ;;  %v2502_v63 = vld [vmem:[#allocation10 + $0x58] sm:$0xff] }
 0x17e   :  { %2438 = vmatprep.subr.bf16.mxu1 %v3648_v0  ;;  %v3143_v0 = vpack.c.bf16 %v2502_v63, %v2501_v62  ;;  %v2551_v63 = vld [vmem:[#allocation10 + $0x1e0] sm:$0xff] }
 0x180   :  { %2398 = vmatpush1.bf16.msra.mxu0 %v3643_v1  ;;  %v2519_v1 = vld [vmem:[#allocation10 + $0xe0] sm:$0xff] }
 0x181   :  { %2439 = vmatpush1.bf16.msra.mxu1 %v3646_v2  ;;  %2399 = vmatprep.subr.bf16.mxu0 %v3651_v3  ;;  %v2520_v2 = vld [vmem:[#allocation10 + $0xe8] sm:$0xff] }
 0x182   :  { %2440 = vmatprep.subr.bf16.mxu1 %v3654_v4  ;;  %v3145_v3 = vpack.c.bf16 %v2520_v2, %v2519_v1  ;;  %v2503_v4 = vld [vmem:[#allocation10 + $0x60] sm:$0xff] }
 0x184   :  { %2400 = vmatpush1.bf16.msra.mxu0 %v3649_v5  ;;  %v2504_v5 = vld [vmem:[#allocation10 + $0x68] sm:$0xff] }
 0x185   :  { %2441 = vmatpush1.bf16.msra.mxu1 %v3652_v8  ;;  %2401 = vmatprep.subr.bf16.mxu0 %v3657_v9 }
 0x186   :  { %2442 = vmatprep.subr.bf16.mxu1 %v3660_v10 }
 0x188   :  { %2402 = vmatpush1.bf16.msra.mxu0 %v3655_v11 }
 0x189   :  { %2443 = vmatpush1.bf16.msra.mxu1 %v3658_v12  ;;  %2403 = vmatprep.subr.bf16.mxu0 %v3663_v13 }
 0x18a   :  { %2444 = vmatprep.subr.bf16.mxu1 %v3666_v18 }
 0x18c   :  { %2404 = vmatpush1.bf16.msra.mxu0 %v3661_v22 }
 0x18d   :  { %2445 = vmatpush1.bf16.msra.mxu1 %v3664_v23  ;;  %2405 = vmatprep.subr.bf16.mxu0 %v3669_v24  ;;  %v3147_v23 = vpack.c.bf16 %v2504_v5, %v2503_v4  ;;  %v2521_v24 = vld [vmem:[#allocation10 + $0xf0] sm:$0xff]  ;;  %v2535_v5 = vld [vmem:[#allocation10 + $0x160] sm:$0xff] }
 0x18e   :  { %2446 = vmatprep.subr.bf16.mxu1 %v3672_v14  ;;  %v2522_v14 = vld [vmem:[#allocation10 + $0xf8] sm:$0xff] }
 0x190   :  { %2406 = vmatpush1.bf16.msra.mxu0 %v3667_v7 }
 0x191   :  { %2447 = vmatpush1.bf16.msra.mxu1 %v3670_v25  ;;  %2407 = vmatprep.subr.bf16.mxu0 %v3675_v26  ;;  %v3149_v26 = vpack.c.bf16 %v2522_v14, %v2521_v24 }
 0x192   :  { %2448 = vmatprep.subr.bf16.mxu1 %v3678_v27  ;;  %v2505_v27 = vld [vmem:[#allocation10 + $0x70] sm:$0xff] }
 0x194   :  { %2408 = vmatpush1.bf16.msra.mxu0 %v3673_v28  ;;  %v2506_v28 = vld [vmem:[#allocation10 + $0x78] sm:$0xff] }
 0x195   :  { %2449 = vmatpush1.bf16.msra.mxu1 %v3676_v29  ;;  %2409 = vmatprep.subr.bf16.mxu0 %v3681_v21  ;;  %v3151_v29 = vpack.c.bf16 %v2506_v28, %v2505_v27  ;;  %v2539_v21 = vld [vmem:[#allocation10 + $0x180] sm:$0xff]  ;;  %v2538_v27 = vld [vmem:[#allocation10 + $0x178] sm:$0xff] }
 0x196   :  { %2450 = vmatprep.subr.bf16.mxu1 %v3684_v30  ;;  %v2540_v30 = vld [vmem:[#allocation10 + $0x188] sm:$0xff] }
 0x197   :  { %v3153_v32 = vpack.c.bf16 %v2540_v30, %v2539_v21  ;;  %v2461_v30 = vld [vmem:[%s4029_s4] sm:$0xf] }
 0x198   :  { %2410 = vmatpush1.bf16.msra.mxu0 %v3679_v33  ;;  %v2524_v33 = vld [vmem:[#allocation10 + $0x108] sm:$0xff] }
 0x199   :  { %2451 = vmatpush1.bf16.msra.mxu1 %v3682_v19  ;;  %3122 = vmatprep.subr.bf16.mxu0 %v3121_v34  ;;  %v2541_v19 = vld [vmem:[#allocation10 + $0x190] sm:$0xff]  ;;  %v2542_v34 = vld [vmem:[#allocation10 + $0x198] sm:$0xff]  ;;  %v3155_v16 = vpack.c.bf16 %v2524_v33, %v2523_v31 }
 0x19a   :  { %v3157_v35 = vpack.c.bf16 %v2542_v34, %v2541_v19  ;;  %3154 = vmatprep.subr.bf16.mxu1 %v3153_v32 }
 0x19b   :  { %2412 = vmatmul.mubr.bf16.vlgmr.msra.gmra.mrb[16].mxu0 %v3973_v20  ;;  %v3135_v20 = vpack.c.bf16 %v2498_v53, %v2497_v52  ;;  %v3167_v52 = vpack.c.bf16 %v2530_v49, %v2529_v47 }
 0x19c   :  { %2453 = vmatmul.mubr.bf16.vlgmr.msra.gmra.mrb[16].mxu1 %v3987_v15  ;;  %3124 = vmatpush3.bf16.msra.mxu0 %v3123_v6  ;;  %v3137_v15 = vpack.c.bf16 %v2516_v55, %v2515_v54  ;;  %v2543_v6 = vld [vmem:[#allocation10 + $0x1a0] sm:$0xff]  ;;  %v2532_v55 = vld [vmem:[#allocation10 + $0x148] sm:$0xff] }
 0x19d   :  { %3126 = vmatprep.subr.bf16.mxu0 %v3125_v37  ;;  %v2544_v37 = vld [vmem:[#allocation10 + $0x1a8] sm:$0xff]  ;;  %3156 = vmatpush3.bf16.msra.mxu1 %v3155_v16  ;;  %v2531_v54 = vld [vmem:[#allocation10 + $0x140] sm:$0xff] }
 0x19e   :  { %3158 = vmatprep.subr.bf16.mxu1 %v3157_v35  ;;  %v3161_v39 = vpack.c.bf16 %v2544_v37, %v2543_v6  ;;  %v3171_v56 = vpack.c.bf16 %v2532_v55, %v2531_v54 }
 0x1a0   :  { %3128 = vmatpush3.bf16.msra.mxu0 %v3127_v42  ;;  %v2545_v42 = vld [vmem:[#allocation10 + $0x1b0] sm:$0xff] }
 0x1a1   :  { %3130 = vmatprep.subr.bf16.mxu0 %v3129_v43  ;;  %v2546_v43 = vld [vmem:[#allocation10 + $0x1b8] sm:$0xff]  ;;  %3160 = vmatpush3.bf16.msra.mxu1 %v3159_v38 }
 0x1a2   :  { %3162 = vmatprep.subr.bf16.mxu1 %v3161_v39  ;;  %v3165_v46 = vpack.c.bf16 %v2546_v43, %v2545_v42 }
 0x1a4   :  { %3132 = vmatpush3.bf16.msra.mxu0 %v3131_v50  ;;  %v2547_v50 = vld [vmem:[#allocation10 + $0x1c0] sm:$0xff] }
 0x1a5   :  { %3134 = vmatprep.subr.bf16.mxu0 %v3133_v51  ;;  %v2548_v51 = vld [vmem:[#allocation10 + $0x1c8] sm:$0xff]  ;;  %3164 = vmatpush3.bf16.msra.mxu1 %v3163_v44 }
 0x1a6   :  { %3166 = vmatprep.subr.bf16.mxu1 %v3165_v46  ;;  %v3169_v53 = vpack.c.bf16 %v2548_v51, %v2547_v50 }
 0x1a8   :  { %3136 = vmatpush3.bf16.msra.mxu0 %v3135_v20  ;;  %v2549_v20 = vld [vmem:[#allocation10 + $0x1d0] sm:$0xff] }
 0x1a9   :  { %3138 = vmatprep.subr.bf16.mxu0 %v3137_v15  ;;  %v2550_v15 = vld [vmem:[#allocation10 + $0x1d8] sm:$0xff]  ;;  %3168 = vmatpush3.bf16.msra.mxu1 %v3167_v52 }
 0x1aa   :  { %3170 = vmatprep.subr.bf16.mxu1 %v3169_v53  ;;  %v3173_v57 = vpack.c.bf16 %v2550_v15, %v2549_v20 }
 0x1ac   :  { %3140 = vmatpush3.bf16.msra.mxu0 %v3139_v60  ;;  %v3175_v60 = vpack.c.bf16 %v2534_v59, %v2533_v58 }
 0x1ad   :  { %3142 = vmatprep.subr.bf16.mxu0 %v3141_v61  ;;  %3172 = vmatpush3.bf16.msra.mxu1 %v3171_v56 }
 0x1ae   :  { %v1186_v8 = vpop.f32.mrb[4].mxu0  ;;  %3174 = vmatprep.subr.bf16.mxu1 %v3173_v57 }
 0x1af   :  { %v1227_v9 = vpop.f32.mrb[4].mxu1  ;;  %v1188_v11 = vpop.f32.mrb[5].mxu0 }
 0x1b0   :  { %v3999_v10 = vadd.f32 %v1227_v9, %v1186_v8  ;;  %v1229_v12 = vpop.f32.mrb[5].mxu1  ;;  %v1190_v18 = vpop.f32.mrb[6].mxu0  ;;  %3144 = vmatpush3.bf16.msra.mxu0 %v3143_v0  ;;  %v2552_v0 = vld [vmem:[#allocation10 + $0x1e8] sm:$0xff] }
 0x1b1   :  { %v4001_v13 = vadd.f32 %v1229_v12, %v1188_v11  ;;  %v1231_v22 = vpop.f32.mrb[6].mxu1  ;;  %v1191_v7 = vpop.f32.mrb[7].mxu0  ;;  %3146 = vmatprep.subr.bf16.mxu0 %v3145_v3  ;;  %3176 = vmatpush3.bf16.msra.mxu1 %v3175_v60  ;;  %v3177_v4 = vpack.c.bf16 %v2552_v0, %v2551_v63  ;;  %v2536_v8 = vld [vmem:[#allocation10 + $0x168] sm:$0xff] }
 0x1b2   :  { %v1232_v25 = vpop.f32.mrb[7].mxu1  ;;  %v3179_v18 = vpack.c.bf16 %v2536_v8, %v2535_v5  ;;  %v2553_v7 = vld [vmem:[#allocation10 + $0x1f0] sm:$0xff] }
 0x1b3   :  { %3178 = vmatprep.subr.bf16.mxu1 %v3177_v4  ;;  %v2554_v25 = vld [vmem:[#allocation10 + $0x1f8] sm:$0xff] }
 0x1b4   :  { %3148 = vmatpush3.bf16.msra.mxu0 %v3147_v23 }
 0x1b5   :  { %3150 = vmatprep.subr.bf16.mxu0 %v3149_v26  ;;  %3180 = vmatpush3.bf16.msra.mxu1 %v3179_v18  ;;  %v3181_v26 = vpack.c.bf16 %v2554_v25, %v2553_v7 }
 0x1b7   :  { %3182 = vmatprep.subr.bf16.mxu1 %v3181_v26 }
 0x1b8   :  { %3152 = vmatpush3.bf16.msra.mxu0 %v3151_v29  ;;  %v2463_v29 = vlaneseq }
 0x1ba   :  { %v2464_v21 = vshrl.u32 %v2463_v29, 7 }
 0x1bc   :  { %v2469_v31 = vsub.s32 1, %v2464_v21  ;;  %v2473_v47 = vsub.s32 2, %v2464_v21  ;;  %v2477_v49 = vsub.s32 3, %v2464_v21 }
 0x1be   :  { %v2470_v34 = vrot.slane %v2461_v30, %v2469_v31  ;;  %v2474_v52 = vrot.slane %v2461_v30, %v2473_v47 }
 0x1ee   :  { %v2249_v61 = vpop.f32.mrb[8].mxu0 }
 0x1ef   :  { %v2290_v62 = vpop.f32.mrb[8].mxu1  ;;  %v2250_v1 = vadd.f32 %v2249_v61, %v3993_v45  ;;  %v2251_v2 = vpop.f32.mrb[9].mxu0  ;;  %v2537_v45 = vld [vmem:[#allocation10 + $0x170] sm:$0xff] }
 0x1f0   :  { %v2292_v3 = vpop.f32.mrb[9].mxu1  ;;  %v2252_v9 = vadd.f32 %v2251_v2, %v3995_v48  ;;  %v2253_v11 = vpop.f32.mrb[10].mxu0  ;;  %v3183_v28 = vpack.c.bf16 %v2538_v27, %v2537_v45  ;;  %v2465_v48 = vsub.s32 0, %v2464_v21 }
 0x1f1   :  { %v2294_v12 = vpop.f32.mrb[10].mxu1  ;;  %v2291_v22 = vadd.f32 %v2290_v62, %v2250_v1  ;;  %v2254_v23 = vpop.f32.mrb[11].mxu0 }
 0x1f2   :  { %v2295_v24 = vpop.f32.mrb[11].mxu1  ;;  %v2293_v14 = vadd.f32 %v2292_v3, %v2252_v9  ;;  %3184 = vmatpush3.bf16.msra.mxu1 %v3183_v28  ;;  %v2466_v32 = vrot.slane %v2461_v30, %v2465_v48  ;;  %v3050_v3 = vld [vmem:[%s4031_s6] ss:$0 sm:$0xff] }
 0x22e   :  { %v2331_v33 = vpop.f32.mrb[12].mxu0 }
 0x22f   :  { %v2372_v19 = vpop.f32.mrb[12].mxu1  ;;  %v2332_v16 = vadd.f32 %v2331_v33, %v2291_v22  ;;  %v2333_v36 = vpop.f32.mrb[13].mxu0 }
 0x230   :  { %v2373_v35 = vadd.f32 %v2372_v19, %v3999_v10  ;;  %v2374_v17 = vpop.f32.mrb[13].mxu1  ;;  %v2334_v6 = vadd.f32 %v2333_v36, %v2293_v14  ;;  %v2335_v38 = vpop.f32.mrb[14].mxu0 }
 0x231   :  { %v2375_v37 = vadd.f32 %v2374_v17, %v4001_v13  ;;  %v2376_v39 = vpop.f32.mrb[14].mxu1  ;;  %v2483_v40 = vadd.f32 %v2466_v32, %v2332_v16  ;;  %v2336_v41 = vpop.f32.mrb[15].mxu0  ;;  %v2478_v13 = vrot.slane %v2461_v30, %v2477_v49 }
 0x232   :  { %v2377_v42 = vpop.f32.mrb[15].mxu1  ;;  %v2484_v43 = vadd.f32 %v2470_v34, %v2334_v6 }
 0x233   :  { %v2487_v46 = vmax.f32 %v2483_v40, 0.0 }
 0x234   :  { %v2488_v44 = vmax.f32 %v2484_v43, 0.0 }
 0x236   :  { %2626 = vmatprep.mubr.f32.mxu0 %v2488_v44 }
 0x237   :  { %2627 = vmatmul.mubr.f32.vlgmr.msra.gmra.mrb[20].mxu0 %v2487_v46 }
 0x26e   :  { %v2413_v50 = vpop.f32.mrb[16].mxu0 }
 0x26f   :  { %v2454_v51 = vpop.f32.mrb[16].mxu1  ;;  %v2414_v10 = vadd.f32 %v2413_v50, %v2373_v35  ;;  %v2415_v53 = vpop.f32.mrb[17].mxu0 }
 0x270   :  { %v2456_v54 = vpop.f32.mrb[17].mxu1  ;;  %v2416_v55 = vadd.f32 %v2415_v53, %v2375_v37  ;;  %v2417_v20 = vpop.f32.mrb[18].mxu0 }
 0x271   :  { %v2458_v15 = vpop.f32.mrb[18].mxu1  ;;  %v2455_v56 = vadd.f32 %v2454_v51, %v2414_v10  ;;  %v2418_v57 = vpop.f32.mrb[19].mxu0 }
 0x272   :  { %v2459_v58 = vpop.f32.mrb[19].mxu1  ;;  %v2457_v59 = vadd.f32 %v2456_v54, %v2416_v55 }
 0x273   :  { %v2485_v60 = vadd.f32 %v2474_v52, %v2455_v56 }
 0x274   :  { %v2486_v61 = vadd.f32 %v2478_v13, %v2457_v59 }
 0x275   :  { %v2489_v63 = vmax.f32 %v2485_v60, 0.0 }
 0x276   :  { %v2490_v62 = vmax.f32 %v2486_v61, 0.0 }
 0x278   :  { %2696 = vmatprep.mubr.f32.mxu1 %v2490_v62 }
 0x279   :  { %2697 = vmatmul.mubr.f32.vlgmr.msra.gmra.mrb[20].mxu1 %v2489_v63 }
 0x30a   :  { %v3083_v0 = vpop.f32.mrb[20].mxu0 }
 0x30b   :  { %v3084_v1 = vpop.f32.mrb[21].mxu0 }
 0x30c   :  { %v3085_v2 = vadd.f32 %v3084_v1, %v3083_v0 }
 0x30e   :  { %v2629_v8 = vadd.f32 %v3085_v2, %v3050_v3 }
 0x34c   :  { %v3118_v4 = vpop.f32.mrb[20].mxu1 }
 0x34d   :  { %v3119_v5 = vpop.f32.mrb[21].mxu1 }
 0x34e   :  { %v3120_v9 = vadd.f32 %v3119_v5, %v3118_v4 }
 0x350   :  { %v2699_v11 = vadd.f32 %v3120_v9, %v2629_v8 }
 0x352   :  { %2702 = vst [vmem:[#allocation11] sm:$0xff] %v2699_v11 }
 0x353   :  { %3806 = shalt.err (!%p3803_p2)
}
 0x354   :  { %s3807_s6 = scalar_lea.hbm %s4032_s7, 128 }
 0x355   :  { %p3808_p3 = scmp.ne.s32.totalorder %s4032_s7, %s3807_s6  ;;  %p3811_p4 = scmp.lt.u32.totalorder %s3807_s6, %s4032_s7 }
 0x357   :  { %p3813_p5 = pnand %p3811_p4, %p3808_p3 }
 0x359   :  { %3816 = shalt.err (!%p3813_p5)
}
 0x35a   :  { %2712 = dma.vmem_to_hbm [thread:$0]  %s2710_s17, 128, %s4032_s7, [#allocation4]  }
 0x35b   :  { %3823 = dma.done.wait [#allocation4], 128  }
 0x35c   :  { %3824 = vsyncadd [#allocation4], 4294967168 }
 0x35d   :  { %2716 = vsyncpa [#allocation3], 1 }
 0x35e   :  { %2717 = vsyncpa [#allocation6], 1 }
 0x35f   :  { %2718 = vsyncpa [#allocation9], 1 }
 0x360   :  { %2719 = vsyncpa [#allocation4], 1 }

</bundles_post_ra>
